<compile_context>
chip_gen: v5e
topology: v5e:2x2
jax: 0.10.0
libtpu: 0.0.40
codegen_flags: <defaults>
</compile_context>

<pallas_src>
import functools

import jax
import jax.numpy as jnp
from jax.experimental import pallas as pl
from jax.experimental.pallas import tpu as pltpu

# ---------------- configuration (small, consistent with the module) ----------
D_MODEL = 32
N_HEADS = 4
DIM_FFN = 64
NUM_LAYERS = 3
NUM_QUERIES = 8       # tgt length
MEM_LEN = 16          # memory length (H*W of the encoder feature map)
BATCH = 2
LN_EPS = 1e-5
LANES = 128

# ---------------- packed parameter slab layout (per layer) -------------------
# Weight slab (W_ROWS, 128): each Linear weight is pre-transposed to (in, out)
# and stored at rows [r0, r0+in), lanes [0, out).
W_OFF = {
    "sa_wq": (0,   D_MODEL, D_MODEL),
    "sa_wk": (32,  D_MODEL, D_MODEL),
    "sa_wv": (64,  D_MODEL, D_MODEL),
    "sa_wo": (96,  D_MODEL, D_MODEL),
    "ca_wq": (128, D_MODEL, D_MODEL),
    "ca_wk": (160, D_MODEL, D_MODEL),
    "ca_wv": (192, D_MODEL, D_MODEL),
    "ca_wo": (224, D_MODEL, D_MODEL),
    "l1_w":  (256, D_MODEL, DIM_FFN),
    "l2_w":  (288, DIM_FFN, D_MODEL),
}
W_ROWS = 352          # multiple of 8 sublanes

# Vector slab (N_VEC, 128): one bias / LayerNorm vector per row, lanes [0, width).
V_ROW = {
    "sa_bq": 0, "sa_bk": 1, "sa_bv": 2, "sa_bo": 3,
    "ca_bq": 4, "ca_bk": 5, "ca_bv": 6, "ca_bo": 7,
    "n1_g": 8, "n1_b": 9, "n2_g": 10, "n2_b": 11, "n3_g": 12, "n3_b": 13,
    "l1_b": 14, "l2_b": 15,
}
ROW_FN_G = 16         # decoder-level norm gamma (replicated per layer)
ROW_FN_B = 17         # decoder-level norm beta
N_VEC = 24            # padded to a multiple of 8 sublanes


# ---------------- in-kernel helpers ------------------------------------------
def _layer_norm(x, gamma, beta):
    """LayerNorm over the last dim (PyTorch semantics, eps=1e-5)."""
    mu = jnp.mean(x, axis=-1, keepdims=True)
    xc = x - mu
    var = jnp.mean(xc * xc, axis=-1, keepdims=True)
    return xc * jax.lax.rsqrt(var + LN_EPS) * gamma + beta


# ---------------- fused decoder kernel ----------------------------------------
def fused_decoder_kernel(tgt_ref, qpos_ref, mem_ref, pos_ref, w_ref, vec_ref,
                         out_ref, carry_ref, *, nheads):
    """One (batch-element b, layer l) grid step of the full decoder stack.

    Refs (leading grid dims squeezed by the BlockSpecs):
      tgt_ref, qpos_ref : (L, E)   for batch element b = program_id(0)
      mem_ref, pos_ref  : (M, E)
      w_ref             : (W_ROWS, 128)  weight slab for layer l = program_id(1)
      vec_ref           : (N_VEC, 128)   bias / LN-vector slab for layer l
      out_ref           : (L, E)   -> intermediate[l, b]
      carry_ref         : VMEM scratch (L, E), the un-normed running `tgt`
    """
    layer = pl.program_id(1)

    @pl.when(layer == 0)
    def _init():
        carry_ref[...] = tgt_ref[...]

    x = carry_ref[...]                 # (L, E)
    qpos = qpos_ref[...]               # (L, E)
    mem = mem_ref[...]                 # (M, E)
    pos = pos_ref[...]                 # (M, E)
    E = x.shape[-1]
    dh = E // nheads
    scale = float(dh) ** -0.5

    def W(name):
        r0, rows, cols = W_OFF[name]
        return w_ref[r0:r0 + rows, 0:cols]           # (in, out), no transpose

    def V(name, width=D_MODEL):
        r = V_ROW[name]
        return vec_ref[r:r + 1, 0:width]              # (1, width), row-broadcast

    def attention(q_in, k_in, v_in, pre):
        """nn.MultiheadAttention (dropout=0, no masks) for one batch element."""
        q = (jnp.dot(q_in, W(pre + "_wq"), preferred_element_type=jnp.float32)
             + V(pre + "_bq")) * scale
        k = jnp.dot(k_in, W(pre + "_wk"), preferred_element_type=jnp.float32) + V(pre + "_bk")
        v = jnp.dot(v_in, W(pre + "_wv"), preferred_element_type=jnp.float32) + V(pre + "_bv")
        heads = []
        for h in range(nheads):                       # static unroll, H small
            sl = slice(h * dh, (h + 1) * dh)
            s = jax.lax.dot_general(q[:, sl], k[:, sl],
                                    (((1,), (1,)), ((), ())),   # q @ k^T
                                    preferred_element_type=jnp.float32)
            s = s - jnp.max(s, axis=-1, keepdims=True)
            e = jnp.exp(s)
            p = e / jnp.sum(e, axis=-1, keepdims=True)
            heads.append(jnp.dot(p, v[:, sl], preferred_element_type=jnp.float32))
        o = jnp.concatenate(heads, axis=-1)           # (Lq, E)
        return jnp.dot(o, W(pre + "_wo"), preferred_element_type=jnp.float32) + V(pre + "_bo")

    # --- self attention: q = k = x + query_pos, value = x (post-norm residual)
    qk = x + qpos
    sa = attention(qk, qk, x, "sa")
    x = _layer_norm(x + sa, V("n1_g"), V("n1_b"))

    # --- cross attention: q = x + query_pos, k = memory + pos, v = memory
    ca = attention(x + qpos, mem + pos, mem, "ca")
    x = _layer_norm(x + ca, V("n2_g"), V("n2_b"))

    # --- feed-forward: linear2(relu(linear1(x)))
    h = jnp.maximum(
        jnp.dot(x, W("l1_w"), preferred_element_type=jnp.float32) + V("l1_b", DIM_FFN),
        0.0)
    y = jnp.dot(h, W("l2_w"), preferred_element_type=jnp.float32) + V("l2_b")
    x = _layer_norm(x + y, V("n3_g"), V("n3_b"))

    carry_ref[...] = x                                # carry to next layer
    # decoder-level norm (self.norm) applied to every intermediate / final output
    out_ref[...] = _layer_norm(x,
                               vec_ref[ROW_FN_G:ROW_FN_G + 1, 0:E],
                               vec_ref[ROW_FN_B:ROW_FN_B + 1, 0:E])


# ---------------- host-side parameter packing ----------------------------------
def pack_decoder_params(layer_params, norm_params):
    """Pack per-layer PyTorch-convention params into two dense 128-lane slabs."""
    n = len(layer_params)
    w_slab = jnp.zeros((n, W_ROWS, LANES), jnp.float32)
    v_slab = jnp.zeros((n, N_VEC, LANES), jnp.float32)
    fn_g, fn_b = norm_params
    for i, p in enumerate(layer_params):
        for name, (r0, rows, cols) in W_OFF.items():
            w_slab = w_slab.at[i, r0:r0 + rows, 0:cols].set(p[name].T)  # (in,out)
        for name, r in V_ROW.items():
            vec = p[name].reshape(-1)
            v_slab = v_slab.at[i, r, 0:vec.shape[0]].set(vec)
        v_slab = v_slab.at[i, ROW_FN_G, 0:fn_g.shape[-1]].set(fn_g.reshape(-1))
        v_slab = v_slab.at[i, ROW_FN_B, 0:fn_b.shape[-1]].set(fn_b.reshape(-1))
    return w_slab, v_slab


# ---------------- wrapper -------------------------------------------------------
def transformer_decoder_clip(tgt, memory, w_slab, v_slab, query_pos, pos,
                             return_intermediate=True, nheads=N_HEADS):
    """Mirrors TransformerDecoderCLIP.forward (masks / sup_memory = None).

    tgt, query_pos: (L, B, E); memory, pos: (M, B, E).
    Returns (num_layers, L, B, E) if return_intermediate else (L, B, E).
    """
    L, B, E = tgt.shape
    M = memory.shape[0]
    num_layers = w_slab.shape[0]

    # one-time layout plumbing: batch-major inside the kernel
    tgt_b = jnp.transpose(tgt, (1, 0, 2))
    qpos_b = jnp.transpose(query_pos, (1, 0, 2))
    mem_b = jnp.transpose(memory, (1, 0, 2))
    pos_b = jnp.transpose(pos, (1, 0, 2))

    out = pl.pallas_call(
        functools.partial(fused_decoder_kernel, nheads=nheads),
        out_shape=jax.ShapeDtypeStruct((num_layers, B, L, E), tgt.dtype),
        grid=(B, num_layers),
        in_specs=[
            pl.BlockSpec((None, L, E), lambda b, l: (b, 0, 0)),          # tgt
            pl.BlockSpec((None, L, E), lambda b, l: (b, 0, 0)),          # query_pos
            pl.BlockSpec((None, M, E), lambda b, l: (b, 0, 0)),          # memory
            pl.BlockSpec((None, M, E), lambda b, l: (b, 0, 0)),          # pos
            pl.BlockSpec((None, W_ROWS, LANES), lambda b, l: (l, 0, 0)),  # weights
            pl.BlockSpec((None, N_VEC, LANES), lambda b, l: (l, 0, 0)),   # vectors
        ],
        out_specs=pl.BlockSpec((None, None, L, E), lambda b, l: (l, b, 0, 0)),
        scratch_shapes=[pltpu.VMEM((L, E), jnp.float32)],                 # carry
        compiler_params=pltpu.CompilerParams(
            dimension_semantics=("parallel", "arbitrary")),
    )(tgt_b, qpos_b, mem_b, pos_b, w_slab, v_slab)

    intermediate = jnp.transpose(out, (0, 2, 1, 3))   # (num_layers, L, B, E)
    if return_intermediate:
        return intermediate
    return intermediate[-1]


# ---------------- deterministic parameter init ----------------------------------
def init_layer_params(key, d_model, dim_ffn):
    ks = jax.random.split(key, 16)
    s = 0.05

    def w(k, shape):
        return jax.random.normal(k, shape, jnp.float32) * s

    return {
        # PyTorch convention: Linear weights are (out_features, in_features)
        "sa_wq": w(ks[0], (d_model, d_model)),
        "sa_wk": w(ks[1], (d_model, d_model)),
        "sa_wv": w(ks[2], (d_model, d_model)),
        "sa_bq": w(ks[3], (d_model,)),
        "sa_bk": w(ks[4], (d_model,)),
        "sa_bv": w(ks[5], (d_model,)),
        "sa_wo": w(ks[6], (d_model, d_model)),
        "sa_bo": w(ks[7], (d_model,)),
        "ca_wq": w(ks[8], (d_model, d_model)),
        "ca_wk": w(ks[9], (d_model, d_model)),
        "ca_wv": w(ks[10], (d_model, d_model)),
        "ca_bq": w(ks[11], (d_model,)),
        "ca_bk": jnp.zeros((d_model,), jnp.float32),
        "ca_bv": jnp.zeros((d_model,), jnp.float32),
        "ca_wo": w(ks[12], (d_model, d_model)),
        "ca_bo": jnp.zeros((d_model,), jnp.float32),
        "n1_g": jnp.ones((d_model,), jnp.float32),
        "n1_b": jnp.zeros((d_model,), jnp.float32),
        "n2_g": jnp.ones((d_model,), jnp.float32),
        "n2_b": jnp.zeros((d_model,), jnp.float32),
        "n3_g": jnp.ones((d_model,), jnp.float32),
        "n3_b": jnp.zeros((d_model,), jnp.float32),
        "l1_w": w(ks[13], (dim_ffn, d_model)),
        "l1_b": w(ks[14], (dim_ffn,)),
        "l2_w": w(ks[15], (d_model, dim_ffn)),
        "l2_b": jnp.zeros((d_model,), jnp.float32),
    }


if __name__ == "__main__":
    root = jax.random.PRNGKey(0)
    k_tgt, k_mem, k_qp, k_pos, k_par = jax.random.split(root, 5)

    tgt = jax.random.normal(k_tgt, (NUM_QUERIES, BATCH, D_MODEL), jnp.float32)
    memory = jax.random.normal(k_mem, (MEM_LEN, BATCH, D_MODEL), jnp.float32)
    query_pos = jax.random.normal(k_qp, (NUM_QUERIES, BATCH, D_MODEL), jnp.float32)
    pos = jax.random.normal(k_pos, (MEM_LEN, BATCH, D_MODEL), jnp.float32)

    layer_keys = jax.random.split(k_par, NUM_LAYERS)
    layer_params = [init_layer_params(k, D_MODEL, DIM_FFN) for k in layer_keys]
    norm_params = (jnp.ones((D_MODEL,), jnp.float32),
                   jnp.zeros((D_MODEL,), jnp.float32))

    # one-time packing into dense slabs
    w_slab, v_slab = pack_decoder_params(layer_params, norm_params)

    fwd = jax.jit(transformer_decoder_clip)
    out = fwd(tgt, memory, w_slab, v_slab, query_pos, pos)
    out = jax.block_until_ready(out)

    assert out.shape == (NUM_LAYERS, NUM_QUERIES, BATCH, D_MODEL), out.shape
    assert bool(jnp.all(jnp.isfinite(out)))
    print("KERNEL_OK")
</pallas_src>

<mosaic_0001>
module attributes {stable_mosaic.version = 11 : i64} {
  func.func @fused_decoder_kernel(%arg0: i32, %arg1: i32, %arg2: memref<1x8x32xf32, #tpu.memory_space<vmem>>, %arg3: memref<1x8x32xf32, #tpu.memory_space<vmem>>, %arg4: memref<1x16x32xf32, #tpu.memory_space<vmem>>, %arg5: memref<1x16x32xf32, #tpu.memory_space<vmem>>, %arg6: memref<1x352x128xf32, #tpu.memory_space<vmem>>, %arg7: memref<1x24x128xf32, #tpu.memory_space<vmem>>, %arg8: memref<1x1x8x32xf32, #tpu.memory_space<vmem>>, %arg9: memref<8x32xf32, #tpu.memory_space<vmem>>) attributes {dimension_semantics = [#tpu.dimension_semantics<parallel>, #tpu.dimension_semantics<arbitrary>], iteration_bounds = array<i64: 2, 3>, scalar_prefetch = 0 : i64, scratch_operands = 1 : i64, tpu.core_type = #tpu.core_type<tc>, window_params = [{transform_indices = @transform_0, window_bounds = array<i64: 1, 8, 32>}, {transform_indices = @transform_1, window_bounds = array<i64: 1, 8, 32>}, {transform_indices = @transform_2, window_bounds = array<i64: 1, 16, 32>}, {transform_indices = @transform_3, window_bounds = array<i64: 1, 16, 32>}, {transform_indices = @transform_4, window_bounds = array<i64: 1, 352, 128>}, {transform_indices = @transform_5, window_bounds = array<i64: 1, 24, 128>}, {transform_indices = @transform_6, window_bounds = array<i64: 1, 1, 8, 32>}]} {
    %c0_i32 = arith.constant 0 : i32
    %0 = arith.cmpi eq, %arg1, %c0_i32 : i32
    %1 = arith.extui %0 : i1 to i32
    %c0_i32_0 = arith.constant 0 : i32
    %2 = arith.cmpi ne, %1, %c0_i32_0 : i32
    scf.if %2 {
      %c0_139 = arith.constant 0 : index
      %c0_140 = arith.constant 0 : index
      %c0_141 = arith.constant 0 : index
      %306 = vector.load %arg2[%c0_139, %c0_140, %c0_141] : memref<1x8x32xf32, #tpu.memory_space<vmem>>, vector<1x8x32xf32>
      %307 = vector.shape_cast %306 : vector<1x8x32xf32> to vector<8x32xf32>
      %c0_142 = arith.constant 0 : index
      %c0_143 = arith.constant 0 : index
      %308 = vector.load %arg9[%c0_142, %c0_143] : memref<8x32xf32, #tpu.memory_space<vmem>>, vector<8x32xf32>
      tpu.vector_store %arg9[%c0_142, %c0_143], %307 {strides = array<i32>} : memref<8x32xf32, #tpu.memory_space<vmem>>, vector<8x32xf32>,
    } else {
    }
    %c0 = arith.constant 0 : index
    %c0_1 = arith.constant 0 : index
    %3 = vector.load %arg9[%c0, %c0_1] : memref<8x32xf32, #tpu.memory_space<vmem>>, vector<8x32xf32>
    %c0_2 = arith.constant 0 : index
    %c0_3 = arith.constant 0 : index
    %c0_4 = arith.constant 0 : index
    %4 = vector.load %arg3[%c0_2, %c0_3, %c0_4] : memref<1x8x32xf32, #tpu.memory_space<vmem>>, vector<1x8x32xf32>
    %5 = vector.shape_cast %4 : vector<1x8x32xf32> to vector<8x32xf32>
    %c0_5 = arith.constant 0 : index
    %c0_6 = arith.constant 0 : index
    %c0_7 = arith.constant 0 : index
    %6 = vector.load %arg4[%c0_5, %c0_6, %c0_7] : memref<1x16x32xf32, #tpu.memory_space<vmem>>, vector<1x16x32xf32>
    %7 = vector.shape_cast %6 : vector<1x16x32xf32> to vector<16x32xf32>
    %c0_8 = arith.constant 0 : index
    %c0_9 = arith.constant 0 : index
    %c0_10 = arith.constant 0 : index
    %8 = vector.load %arg5[%c0_8, %c0_9, %c0_10] : memref<1x16x32xf32, #tpu.memory_space<vmem>>, vector<1x16x32xf32>
    %9 = vector.shape_cast %8 : vector<1x16x32xf32> to vector<16x32xf32>
    %10 = arith.addf %3, %5 : vector<8x32xf32>
    %c0_11 = arith.constant 0 : index
    %c0_12 = arith.constant 0 : index
    %c0_13 = arith.constant 0 : index
    %11 = vector.load %arg6[%c0_11, %c0_12, %c0_13] : memref<1x352x128xf32, #tpu.memory_space<vmem>>, vector<1x32x32xf32>
    %12 = vector.shape_cast %11 : vector<1x32x32xf32> to vector<32x32xf32>
    %cst = arith.constant dense<0.000000e+00> : vector<8x32xf32>
    %13 = tpu.matmul %10, %12, %cst {dimension_numbers = #tpu.dot_dimension_numbers<[1], [0], [0], [1], [0, 0, 1, 1], [], []>} : vector<8x32xf32>, vector<32x32xf32>, vector<8x32xf32> -> vector<8x32xf32>
    %c0_14 = arith.constant 0 : index
    %c0_15 = arith.constant 0 : index
    %c0_16 = arith.constant 0 : index
    %14 = vector.load %arg7[%c0_14, %c0_15, %c0_16] : memref<1x24x128xf32, #tpu.memory_space<vmem>>, vector<1x1x32xf32>
    %15 = vector.shape_cast %14 : vector<1x1x32xf32> to vector<1x32xf32>
    %16 = vector.broadcast %15 : vector<1x32xf32> to vector<8x32xf32>
    %17 = arith.addf %13, %16 : vector<8x32xf32>
    %cst_17 = arith.constant 0.353553385 : f32
    %18 = vector.broadcast %cst_17 : f32 to vector<8x32xf32>
    %19 = arith.mulf %17, %18 : vector<8x32xf32>
    %c0_18 = arith.constant 0 : index
    %c32 = arith.constant 32 : index
    %c0_19 = arith.constant 0 : index
    %20 = vector.load %arg6[%c0_18, %c32, %c0_19] : memref<1x352x128xf32, #tpu.memory_space<vmem>>, vector<1x32x32xf32>
    %21 = vector.shape_cast %20 : vector<1x32x32xf32> to vector<32x32xf32>
    %cst_20 = arith.constant dense<0.000000e+00> : vector<8x32xf32>
    %22 = tpu.matmul %10, %21, %cst_20 {dimension_numbers = #tpu.dot_dimension_numbers<[1], [0], [0], [1], [0, 0, 1, 1], [], []>} : vector<8x32xf32>, vector<32x32xf32>, vector<8x32xf32> -> vector<8x32xf32>
    %c0_21 = arith.constant 0 : index
    %c1 = arith.constant 1 : index
    %c0_22 = arith.constant 0 : index
    %23 = vector.load %arg7[%c0_21, %c1, %c0_22] : memref<1x24x128xf32, #tpu.memory_space<vmem>>, vector<1x1x32xf32>
    %24 = vector.shape_cast %23 : vector<1x1x32xf32> to vector<1x32xf32>
    %25 = vector.broadcast %24 : vector<1x32xf32> to vector<8x32xf32>
    %26 = arith.addf %22, %25 : vector<8x32xf32>
    %c0_23 = arith.constant 0 : index
    %c64 = arith.constant 64 : index
    %c0_24 = arith.constant 0 : index
    %27 = vector.load %arg6[%c0_23, %c64, %c0_24] : memref<1x352x128xf32, #tpu.memory_space<vmem>>, vector<1x32x32xf32>
    %28 = vector.shape_cast %27 : vector<1x32x32xf32> to vector<32x32xf32>
    %cst_25 = arith.constant dense<0.000000e+00> : vector<8x32xf32>
    %29 = tpu.matmul %3, %28, %cst_25 {dimension_numbers = #tpu.dot_dimension_numbers<[1], [0], [0], [1], [0, 0, 1, 1], [], []>} : vector<8x32xf32>, vector<32x32xf32>, vector<8x32xf32> -> vector<8x32xf32>
    %c0_26 = arith.constant 0 : index
    %c2 = arith.constant 2 : index
    %c0_27 = arith.constant 0 : index
    %30 = vector.load %arg7[%c0_26, %c2, %c0_27] : memref<1x24x128xf32, #tpu.memory_space<vmem>>, vector<1x1x32xf32>
    %31 = vector.shape_cast %30 : vector<1x1x32xf32> to vector<1x32xf32>
    %32 = vector.broadcast %31 : vector<1x32xf32> to vector<8x32xf32>
    %33 = arith.addf %29, %32 : vector<8x32xf32>
    %34 = vector.extract_strided_slice %19 {offsets = [0, 0], sizes = [8, 8], strides = [1, 1]} : vector<8x32xf32> to vector<8x8xf32>
    %35 = vector.extract_strided_slice %26 {offsets = [0, 0], sizes = [8, 8], strides = [1, 1]} : vector<8x32xf32> to vector<8x8xf32>
    %cst_28 = arith.constant dense<0.000000e+00> : vector<8x8xf32>
    %36 = tpu.matmul %34, %35, %cst_28 {dimension_numbers = #tpu.dot_dimension_numbers<[1], [1], [0], [0], [0, 0, 1, 0], [], []>} : vector<8x8xf32>, vector<8x8xf32>, vector<8x8xf32> -> vector<8x8xf32>
    %cst_29 = arith.constant dense<0xFF800000> : vector<8xf32>
    %37 = vector.multi_reduction <maximumf>, %36, %cst_29 [1] : vector<8x8xf32> to vector<8xf32>
    %38 = vector.shape_cast %37 : vector<8xf32> to vector<8x1xf32>
    %39 = vector.broadcast %38 : vector<8x1xf32> to vector<8x8xf32>
    %40 = arith.subf %36, %39 : vector<8x8xf32>
    %41 = math.exp %40 : vector<8x8xf32>
    %cst_30 = arith.constant dense<0.000000e+00> : vector<8xf32>
    %42 = vector.multi_reduction <add>, %41, %cst_30 [1] : vector<8x8xf32> to vector<8xf32>
    %43 = vector.shape_cast %42 : vector<8xf32> to vector<8x1xf32>
    %44 = vector.broadcast %43 : vector<8x1xf32> to vector<8x8xf32>
    %45 = arith.divf %41, %44 : vector<8x8xf32>
    %46 = vector.extract_strided_slice %33 {offsets = [0, 0], sizes = [8, 8], strides = [1, 1]} : vector<8x32xf32> to vector<8x8xf32>
    %cst_31 = arith.constant dense<0.000000e+00> : vector<8x8xf32>
    %47 = tpu.matmul %45, %46, %cst_31 {dimension_numbers = #tpu.dot_dimension_numbers<[1], [0], [0], [1], [0, 0, 1, 1], [], []>} : vector<8x8xf32>, vector<8x8xf32>, vector<8x8xf32> -> vector<8x8xf32>
    %48 = vector.extract_strided_slice %19 {offsets = [0, 8], sizes = [8, 8], strides = [1, 1]} : vector<8x32xf32> to vector<8x8xf32>
    %49 = vector.extract_strided_slice %26 {offsets = [0, 8], sizes = [8, 8], strides = [1, 1]} : vector<8x32xf32> to vector<8x8xf32>
    %cst_32 = arith.constant dense<0.000000e+00> : vector<8x8xf32>
    %50 = tpu.matmul %48, %49, %cst_32 {dimension_numbers = #tpu.dot_dimension_numbers<[1], [1], [0], [0], [0, 0, 1, 0], [], []>} : vector<8x8xf32>, vector<8x8xf32>, vector<8x8xf32> -> vector<8x8xf32>
    %cst_33 = arith.constant dense<0xFF800000> : vector<8xf32>
    %51 = vector.multi_reduction <maximumf>, %50, %cst_33 [1] : vector<8x8xf32> to vector<8xf32>
    %52 = vector.shape_cast %51 : vector<8xf32> to vector<8x1xf32>
    %53 = vector.broadcast %52 : vector<8x1xf32> to vector<8x8xf32>
    %54 = arith.subf %50, %53 : vector<8x8xf32>
    %55 = math.exp %54 : vector<8x8xf32>
    %cst_34 = arith.constant dense<0.000000e+00> : vector<8xf32>
    %56 = vector.multi_reduction <add>, %55, %cst_34 [1] : vector<8x8xf32> to vector<8xf32>
    %57 = vector.shape_cast %56 : vector<8xf32> to vector<8x1xf32>
    %58 = vector.broadcast %57 : vector<8x1xf32> to vector<8x8xf32>
    %59 = arith.divf %55, %58 : vector<8x8xf32>
    %60 = vector.extract_strided_slice %33 {offsets = [0, 8], sizes = [8, 8], strides = [1, 1]} : vector<8x32xf32> to vector<8x8xf32>
    %cst_35 = arith.constant dense<0.000000e+00> : vector<8x8xf32>
    %61 = tpu.matmul %59, %60, %cst_35 {dimension_numbers = #tpu.dot_dimension_numbers<[1], [0], [0], [1], [0, 0, 1, 1], [], []>} : vector<8x8xf32>, vector<8x8xf32>, vector<8x8xf32> -> vector<8x8xf32>
    %62 = vector.extract_strided_slice %19 {offsets = [0, 16], sizes = [8, 8], strides = [1, 1]} : vector<8x32xf32> to vector<8x8xf32>
    %63 = vector.extract_strided_slice %26 {offsets = [0, 16], sizes = [8, 8], strides = [1, 1]} : vector<8x32xf32> to vector<8x8xf32>
    %cst_36 = arith.constant dense<0.000000e+00> : vector<8x8xf32>
    %64 = tpu.matmul %62, %63, %cst_36 {dimension_numbers = #tpu.dot_dimension_numbers<[1], [1], [0], [0], [0, 0, 1, 0], [], []>} : vector<8x8xf32>, vector<8x8xf32>, vector<8x8xf32> -> vector<8x8xf32>
    %cst_37 = arith.constant dense<0xFF800000> : vector<8xf32>
    %65 = vector.multi_reduction <maximumf>, %64, %cst_37 [1] : vector<8x8xf32> to vector<8xf32>
    %66 = vector.shape_cast %65 : vector<8xf32> to vector<8x1xf32>
    %67 = vector.broadcast %66 : vector<8x1xf32> to vector<8x8xf32>
    %68 = arith.subf %64, %67 : vector<8x8xf32>
    %69 = math.exp %68 : vector<8x8xf32>
    %cst_38 = arith.constant dense<0.000000e+00> : vector<8xf32>
    %70 = vector.multi_reduction <add>, %69, %cst_38 [1] : vector<8x8xf32> to vector<8xf32>
    %71 = vector.shape_cast %70 : vector<8xf32> to vector<8x1xf32>
    %72 = vector.broadcast %71 : vector<8x1xf32> to vector<8x8xf32>
    %73 = arith.divf %69, %72 : vector<8x8xf32>
    %74 = vector.extract_strided_slice %33 {offsets = [0, 16], sizes = [8, 8], strides = [1, 1]} : vector<8x32xf32> to vector<8x8xf32>
    %cst_39 = arith.constant dense<0.000000e+00> : vector<8x8xf32>
    %75 = tpu.matmul %73, %74, %cst_39 {dimension_numbers = #tpu.dot_dimension_numbers<[1], [0], [0], [1], [0, 0, 1, 1], [], []>} : vector<8x8xf32>, vector<8x8xf32>, vector<8x8xf32> -> vector<8x8xf32>
    %76 = vector.extract_strided_slice %19 {offsets = [0, 24], sizes = [8, 8], strides = [1, 1]} : vector<8x32xf32> to vector<8x8xf32>
    %77 = vector.extract_strided_slice %26 {offsets = [0, 24], sizes = [8, 8], strides = [1, 1]} : vector<8x32xf32> to vector<8x8xf32>
    %cst_40 = arith.constant dense<0.000000e+00> : vector<8x8xf32>
    %78 = tpu.matmul %76, %77, %cst_40 {dimension_numbers = #tpu.dot_dimension_numbers<[1], [1], [0], [0], [0, 0, 1, 0], [], []>} : vector<8x8xf32>, vector<8x8xf32>, vector<8x8xf32> -> vector<8x8xf32>
    %cst_41 = arith.constant dense<0xFF800000> : vector<8xf32>
    %79 = vector.multi_reduction <maximumf>, %78, %cst_41 [1] : vector<8x8xf32> to vector<8xf32>
    %80 = vector.shape_cast %79 : vector<8xf32> to vector<8x1xf32>
    %81 = vector.broadcast %80 : vector<8x1xf32> to vector<8x8xf32>
    %82 = arith.subf %78, %81 : vector<8x8xf32>
    %83 = math.exp %82 : vector<8x8xf32>
    %cst_42 = arith.constant dense<0.000000e+00> : vector<8xf32>
    %84 = vector.multi_reduction <add>, %83, %cst_42 [1] : vector<8x8xf32> to vector<8xf32>
    %85 = vector.shape_cast %84 : vector<8xf32> to vector<8x1xf32>
    %86 = vector.broadcast %85 : vector<8x1xf32> to vector<8x8xf32>
    %87 = arith.divf %83, %86 : vector<8x8xf32>
    %88 = vector.extract_strided_slice %33 {offsets = [0, 24], sizes = [8, 8], strides = [1, 1]} : vector<8x32xf32> to vector<8x8xf32>
    %cst_43 = arith.constant dense<0.000000e+00> : vector<8x8xf32>
    %89 = tpu.matmul %87, %88, %cst_43 {dimension_numbers = #tpu.dot_dimension_numbers<[1], [0], [0], [1], [0, 0, 1, 1], [], []>} : vector<8x8xf32>, vector<8x8xf32>, vector<8x8xf32> -> vector<8x8xf32>
    %90 = tpu.concatenate %47, %61, %75, %89 in 1 : vector<8x8xf32>, vector<8x8xf32>, vector<8x8xf32>, vector<8x8xf32> -> vector<8x32xf32>
    %c0_44 = arith.constant 0 : index
    %c96 = arith.constant 96 : index
    %c0_45 = arith.constant 0 : index
    %91 = vector.load %arg6[%c0_44, %c96, %c0_45] : memref<1x352x128xf32, #tpu.memory_space<vmem>>, vector<1x32x32xf32>
    %92 = vector.shape_cast %91 : vector<1x32x32xf32> to vector<32x32xf32>
    %cst_46 = arith.constant dense<0.000000e+00> : vector<8x32xf32>
    %93 = tpu.matmul %90, %92, %cst_46 {dimension_numbers = #tpu.dot_dimension_numbers<[1], [0], [0], [1], [0, 0, 1, 1], [], []>} : vector<8x32xf32>, vector<32x32xf32>, vector<8x32xf32> -> vector<8x32xf32>
    %c0_47 = arith.constant 0 : index
    %c3 = arith.constant 3 : index
    %c0_48 = arith.constant 0 : index
    %94 = vector.load %arg7[%c0_47, %c3, %c0_48] : memref<1x24x128xf32, #tpu.memory_space<vmem>>, vector<1x1x32xf32>
    %95 = vector.shape_cast %94 : vector<1x1x32xf32> to vector<1x32xf32>
    %96 = vector.broadcast %95 : vector<1x32xf32> to vector<8x32xf32>
    %97 = arith.addf %93, %96 : vector<8x32xf32>
    %98 = arith.addf %3, %97 : vector<8x32xf32>
    %c0_49 = arith.constant 0 : index
    %c8 = arith.constant 8 : index
    %c0_50 = arith.constant 0 : index
    %99 = vector.load %arg7[%c0_49, %c8, %c0_50] : memref<1x24x128xf32, #tpu.memory_space<vmem>>, vector<1x1x32xf32>
    %100 = vector.shape_cast %99 : vector<1x1x32xf32> to vector<1x32xf32>
    %c0_51 = arith.constant 0 : index
    %c9 = arith.constant 9 : index
    %c0_52 = arith.constant 0 : index
    %101 = vector.load %arg7[%c0_51, %c9, %c0_52] : memref<1x24x128xf32, #tpu.memory_space<vmem>>, vector<1x1x32xf32>
    %102 = vector.shape_cast %101 : vector<1x1x32xf32> to vector<1x32xf32>
    %cst_53 = arith.constant dense<0.000000e+00> : vector<8xf32>
    %103 = vector.multi_reduction <add>, %98, %cst_53 [1] : vector<8x32xf32> to vector<8xf32>
    %104 = vector.shape_cast %103 : vector<8xf32> to vector<8x1xf32>
    %cst_54 = arith.constant 3.200000e+01 : f32
    %105 = vector.broadcast %cst_54 : f32 to vector<8x1xf32>
    %106 = arith.divf %104, %105 : vector<8x1xf32>
    %107 = vector.broadcast %106 : vector<8x1xf32> to vector<8x32xf32>
    %108 = arith.subf %98, %107 : vector<8x32xf32>
    %109 = arith.mulf %108, %108 : vector<8x32xf32>
    %cst_55 = arith.constant dense<0.000000e+00> : vector<8xf32>
    %110 = vector.multi_reduction <add>, %109, %cst_55 [1] : vector<8x32xf32> to vector<8xf32>
    %111 = vector.shape_cast %110 : vector<8xf32> to vector<8x1xf32>
    %cst_56 = arith.constant 3.200000e+01 : f32
    %112 = vector.broadcast %cst_56 : f32 to vector<8x1xf32>
    %113 = arith.divf %111, %112 : vector<8x1xf32>
    %cst_57 = arith.constant 9.99999974E-6 : f32
    %114 = vector.broadcast %cst_57 : f32 to vector<8x1xf32>
    %115 = arith.addf %113, %114 : vector<8x1xf32>
    %116 = math.rsqrt %115 : vector<8x1xf32>
    %117 = vector.broadcast %116 : vector<8x1xf32> to vector<8x32xf32>
    %118 = arith.mulf %108, %117 : vector<8x32xf32>
    %119 = vector.broadcast %100 : vector<1x32xf32> to vector<8x32xf32>
    %120 = arith.mulf %118, %119 : vector<8x32xf32>
    %121 = vector.broadcast %102 : vector<1x32xf32> to vector<8x32xf32>
    %122 = arith.addf %120, %121 : vector<8x32xf32>
    %123 = arith.addf %122, %5 : vector<8x32xf32>
    %124 = arith.addf %7, %9 : vector<16x32xf32>
    %c0_58 = arith.constant 0 : index
    %c128 = arith.constant 128 : index
    %c0_59 = arith.constant 0 : index
    %125 = vector.load %arg6[%c0_58, %c128, %c0_59] : memref<1x352x128xf32, #tpu.memory_space<vmem>>, vector<1x32x32xf32>
    %126 = vector.shape_cast %125 : vector<1x32x32xf32> to vector<32x32xf32>
    %cst_60 = arith.constant dense<0.000000e+00> : vector<8x32xf32>
    %127 = tpu.matmul %123, %126, %cst_60 {dimension_numbers = #tpu.dot_dimension_numbers<[1], [0], [0], [1], [0, 0, 1, 1], [], []>} : vector<8x32xf32>, vector<32x32xf32>, vector<8x32xf32> -> vector<8x32xf32>
    %c0_61 = arith.constant 0 : index
    %c4 = arith.constant 4 : index
    %c0_62 = arith.constant 0 : index
    %128 = vector.load %arg7[%c0_61, %c4, %c0_62] : memref<1x24x128xf32, #tpu.memory_space<vmem>>, vector<1x1x32xf32>
    %129 = vector.shape_cast %128 : vector<1x1x32xf32> to vector<1x32xf32>
    %130 = vector.broadcast %129 : vector<1x32xf32> to vector<8x32xf32>
    %131 = arith.addf %127, %130 : vector<8x32xf32>
    %cst_63 = arith.constant 0.353553385 : f32
    %132 = vector.broadcast %cst_63 : f32 to vector<8x32xf32>
    %133 = arith.mulf %131, %132 : vector<8x32xf32>
    %c0_64 = arith.constant 0 : index
    %c160 = arith.constant 160 : index
    %c0_65 = arith.constant 0 : index
    %134 = vector.load %arg6[%c0_64, %c160, %c0_65] : memref<1x352x128xf32, #tpu.memory_space<vmem>>, vector<1x32x32xf32>
    %135 = vector.shape_cast %134 : vector<1x32x32xf32> to vector<32x32xf32>
    %cst_66 = arith.constant dense<0.000000e+00> : vector<16x32xf32>
    %136 = tpu.matmul %124, %135, %cst_66 {dimension_numbers = #tpu.dot_dimension_numbers<[1], [0], [0], [1], [0, 0, 1, 1], [], []>} : vector<16x32xf32>, vector<32x32xf32>, vector<16x32xf32> -> vector<16x32xf32>
    %c0_67 = arith.constant 0 : index
    %c5 = arith.constant 5 : index
    %c0_68 = arith.constant 0 : index
    %137 = vector.load %arg7[%c0_67, %c5, %c0_68] : memref<1x24x128xf32, #tpu.memory_space<vmem>>, vector<1x1x32xf32>
    %138 = vector.shape_cast %137 : vector<1x1x32xf32> to vector<1x32xf32>
    %139 = vector.broadcast %138 : vector<1x32xf32> to vector<16x32xf32>
    %140 = arith.addf %136, %139 : vector<16x32xf32>
    %c0_69 = arith.constant 0 : index
    %c192 = arith.constant 192 : index
    %c0_70 = arith.constant 0 : index
    %141 = vector.load %arg6[%c0_69, %c192, %c0_70] : memref<1x352x128xf32, #tpu.memory_space<vmem>>, vector<1x32x32xf32>
    %142 = vector.shape_cast %141 : vector<1x32x32xf32> to vector<32x32xf32>
    %cst_71 = arith.constant dense<0.000000e+00> : vector<16x32xf32>
    %143 = tpu.matmul %7, %142, %cst_71 {dimension_numbers = #tpu.dot_dimension_numbers<[1], [0], [0], [1], [0, 0, 1, 1], [], []>} : vector<16x32xf32>, vector<32x32xf32>, vector<16x32xf32> -> vector<16x32xf32>
    %c0_72 = arith.constant 0 : index
    %c6 = arith.constant 6 : index
    %c0_73 = arith.constant 0 : index
    %144 = vector.load %arg7[%c0_72, %c6, %c0_73] : memref<1x24x128xf32, #tpu.memory_space<vmem>>, vector<1x1x32xf32>
    %145 = vector.shape_cast %144 : vector<1x1x32xf32> to vector<1x32xf32>
    %146 = vector.broadcast %145 : vector<1x32xf32> to vector<16x32xf32>
    %147 = arith.addf %143, %146 : vector<16x32xf32>
    %148 = vector.extract_strided_slice %133 {offsets = [0, 0], sizes = [8, 8], strides = [1, 1]} : vector<8x32xf32> to vector<8x8xf32>
    %149 = vector.extract_strided_slice %140 {offsets = [0, 0], sizes = [16, 8], strides = [1, 1]} : vector<16x32xf32> to vector<16x8xf32>
    %cst_74 = arith.constant dense<0.000000e+00> : vector<8x16xf32>
    %150 = tpu.matmul %148, %149, %cst_74 {dimension_numbers = #tpu.dot_dimension_numbers<[1], [1], [0], [0], [0, 0, 1, 0], [], []>} : vector<8x8xf32>, vector<16x8xf32>, vector<8x16xf32> -> vector<8x16xf32>
    %cst_75 = arith.constant dense<0xFF800000> : vector<8xf32>
    %151 = vector.multi_reduction <maximumf>, %150, %cst_75 [1] : vector<8x16xf32> to vector<8xf32>
    %152 = vector.shape_cast %151 : vector<8xf32> to vector<8x1xf32>
    %153 = vector.broadcast %152 : vector<8x1xf32> to vector<8x16xf32>
    %154 = arith.subf %150, %153 : vector<8x16xf32>
    %155 = math.exp %154 : vector<8x16xf32>
    %cst_76 = arith.constant dense<0.000000e+00> : vector<8xf32>
    %156 = vector.multi_reduction <add>, %155, %cst_76 [1] : vector<8x16xf32> to vector<8xf32>
    %157 = vector.shape_cast %156 : vector<8xf32> to vector<8x1xf32>
    %158 = vector.broadcast %157 : vector<8x1xf32> to vector<8x16xf32>
    %159 = arith.divf %155, %158 : vector<8x16xf32>
    %160 = vector.extract_strided_slice %147 {offsets = [0, 0], sizes = [16, 8], strides = [1, 1]} : vector<16x32xf32> to vector<16x8xf32>
    %cst_77 = arith.constant dense<0.000000e+00> : vector<8x8xf32>
    %161 = tpu.matmul %159, %160, %cst_77 {dimension_numbers = #tpu.dot_dimension_numbers<[1], [0], [0], [1], [0, 0, 1, 1], [], []>} : vector<8x16xf32>, vector<16x8xf32>, vector<8x8xf32> -> vector<8x8xf32>
    %162 = vector.extract_strided_slice %133 {offsets = [0, 8], sizes = [8, 8], strides = [1, 1]} : vector<8x32xf32> to vector<8x8xf32>
    %163 = vector.extract_strided_slice %140 {offsets = [0, 8], sizes = [16, 8], strides = [1, 1]} : vector<16x32xf32> to vector<16x8xf32>
    %cst_78 = arith.constant dense<0.000000e+00> : vector<8x16xf32>
    %164 = tpu.matmul %162, %163, %cst_78 {dimension_numbers = #tpu.dot_dimension_numbers<[1], [1], [0], [0], [0, 0, 1, 0], [], []>} : vector<8x8xf32>, vector<16x8xf32>, vector<8x16xf32> -> vector<8x16xf32>
    %cst_79 = arith.constant dense<0xFF800000> : vector<8xf32>
    %165 = vector.multi_reduction <maximumf>, %164, %cst_79 [1] : vector<8x16xf32> to vector<8xf32>
    %166 = vector.shape_cast %165 : vector<8xf32> to vector<8x1xf32>
    %167 = vector.broadcast %166 : vector<8x1xf32> to vector<8x16xf32>
    %168 = arith.subf %164, %167 : vector<8x16xf32>
    %169 = math.exp %168 : vector<8x16xf32>
    %cst_80 = arith.constant dense<0.000000e+00> : vector<8xf32>
    %170 = vector.multi_reduction <add>, %169, %cst_80 [1] : vector<8x16xf32> to vector<8xf32>
    %171 = vector.shape_cast %170 : vector<8xf32> to vector<8x1xf32>
    %172 = vector.broadcast %171 : vector<8x1xf32> to vector<8x16xf32>
    %173 = arith.divf %169, %172 : vector<8x16xf32>
    %174 = vector.extract_strided_slice %147 {offsets = [0, 8], sizes = [16, 8], strides = [1, 1]} : vector<16x32xf32> to vector<16x8xf32>
    %cst_81 = arith.constant dense<0.000000e+00> : vector<8x8xf32>
    %175 = tpu.matmul %173, %174, %cst_81 {dimension_numbers = #tpu.dot_dimension_numbers<[1], [0], [0], [1], [0, 0, 1, 1], [], []>} : vector<8x16xf32>, vector<16x8xf32>, vector<8x8xf32> -> vector<8x8xf32>
    %176 = vector.extract_strided_slice %133 {offsets = [0, 16], sizes = [8, 8], strides = [1, 1]} : vector<8x32xf32> to vector<8x8xf32>
    %177 = vector.extract_strided_slice %140 {offsets = [0, 16], sizes = [16, 8], strides = [1, 1]} : vector<16x32xf32> to vector<16x8xf32>
    %cst_82 = arith.constant dense<0.000000e+00> : vector<8x16xf32>
    %178 = tpu.matmul %176, %177, %cst_82 {dimension_numbers = #tpu.dot_dimension_numbers<[1], [1], [0], [0], [0, 0, 1, 0], [], []>} : vector<8x8xf32>, vector<16x8xf32>, vector<8x16xf32> -> vector<8x16xf32>
    %cst_83 = arith.constant dense<0xFF800000> : vector<8xf32>
    %179 = vector.multi_reduction <maximumf>, %178, %cst_83 [1] : vector<8x16xf32> to vector<8xf32>
    %180 = vector.shape_cast %179 : vector<8xf32> to vector<8x1xf32>
    %181 = vector.broadcast %180 : vector<8x1xf32> to vector<8x16xf32>
    %182 = arith.subf %178, %181 : vector<8x16xf32>
    %183 = math.exp %182 : vector<8x16xf32>
    %cst_84 = arith.constant dense<0.000000e+00> : vector<8xf32>
    %184 = vector.multi_reduction <add>, %183, %cst_84 [1] : vector<8x16xf32> to vector<8xf32>
    %185 = vector.shape_cast %184 : vector<8xf32> to vector<8x1xf32>
    %186 = vector.broadcast %185 : vector<8x1xf32> to vector<8x16xf32>
    %187 = arith.divf %183, %186 : vector<8x16xf32>
    %188 = vector.extract_strided_slice %147 {offsets = [0, 16], sizes = [16, 8], strides = [1, 1]} : vector<16x32xf32> to vector<16x8xf32>
    %cst_85 = arith.constant dense<0.000000e+00> : vector<8x8xf32>
    %189 = tpu.matmul %187, %188, %cst_85 {dimension_numbers = #tpu.dot_dimension_numbers<[1], [0], [0], [1], [0, 0, 1, 1], [], []>} : vector<8x16xf32>, vector<16x8xf32>, vector<8x8xf32> -> vector<8x8xf32>
    %190 = vector.extract_strided_slice %133 {offsets = [0, 24], sizes = [8, 8], strides = [1, 1]} : vector<8x32xf32> to vector<8x8xf32>
    %191 = vector.extract_strided_slice %140 {offsets = [0, 24], sizes = [16, 8], strides = [1, 1]} : vector<16x32xf32> to vector<16x8xf32>
    %cst_86 = arith.constant dense<0.000000e+00> : vector<8x16xf32>
    %192 = tpu.matmul %190, %191, %cst_86 {dimension_numbers = #tpu.dot_dimension_numbers<[1], [1], [0], [0], [0, 0, 1, 0], [], []>} : vector<8x8xf32>, vector<16x8xf32>, vector<8x16xf32> -> vector<8x16xf32>
    %cst_87 = arith.constant dense<0xFF800000> : vector<8xf32>
    %193 = vector.multi_reduction <maximumf>, %192, %cst_87 [1] : vector<8x16xf32> to vector<8xf32>
    %194 = vector.shape_cast %193 : vector<8xf32> to vector<8x1xf32>
    %195 = vector.broadcast %194 : vector<8x1xf32> to vector<8x16xf32>
    %196 = arith.subf %192, %195 : vector<8x16xf32>
    %197 = math.exp %196 : vector<8x16xf32>
    %cst_88 = arith.constant dense<0.000000e+00> : vector<8xf32>
    %198 = vector.multi_reduction <add>, %197, %cst_88 [1] : vector<8x16xf32> to vector<8xf32>
    %199 = vector.shape_cast %198 : vector<8xf32> to vector<8x1xf32>
    %200 = vector.broadcast %199 : vector<8x1xf32> to vector<8x16xf32>
    %201 = arith.divf %197, %200 : vector<8x16xf32>
    %202 = vector.extract_strided_slice %147 {offsets = [0, 24], sizes = [16, 8], strides = [1, 1]} : vector<16x32xf32> to vector<16x8xf32>
    %cst_89 = arith.constant dense<0.000000e+00> : vector<8x8xf32>
    %203 = tpu.matmul %201, %202, %cst_89 {dimension_numbers = #tpu.dot_dimension_numbers<[1], [0], [0], [1], [0, 0, 1, 1], [], []>} : vector<8x16xf32>, vector<16x8xf32>, vector<8x8xf32> -> vector<8x8xf32>
    %204 = tpu.concatenate %161, %175, %189, %203 in 1 : vector<8x8xf32>, vector<8x8xf32>, vector<8x8xf32>, vector<8x8xf32> -> vector<8x32xf32>
    %c0_90 = arith.constant 0 : index
    %c224 = arith.constant 224 : index
    %c0_91 = arith.constant 0 : index
    %205 = vector.load %arg6[%c0_90, %c224, %c0_91] : memref<1x352x128xf32, #tpu.memory_space<vmem>>, vector<1x32x32xf32>
    %206 = vector.shape_cast %205 : vector<1x32x32xf32> to vector<32x32xf32>
    %cst_92 = arith.constant dense<0.000000e+00> : vector<8x32xf32>
    %207 = tpu.matmul %204, %206, %cst_92 {dimension_numbers = #tpu.dot_dimension_numbers<[1], [0], [0], [1], [0, 0, 1, 1], [], []>} : vector<8x32xf32>, vector<32x32xf32>, vector<8x32xf32> -> vector<8x32xf32>
    %c0_93 = arith.constant 0 : index
    %c7 = arith.constant 7 : index
    %c0_94 = arith.constant 0 : index
    %208 = vector.load %arg7[%c0_93, %c7, %c0_94] : memref<1x24x128xf32, #tpu.memory_space<vmem>>, vector<1x1x32xf32>
    %209 = vector.shape_cast %208 : vector<1x1x32xf32> to vector<1x32xf32>
    %210 = vector.broadcast %209 : vector<1x32xf32> to vector<8x32xf32>
    %211 = arith.addf %207, %210 : vector<8x32xf32>
    %212 = arith.addf %122, %211 : vector<8x32xf32>
    %c0_95 = arith.constant 0 : index
    %c10 = arith.constant 10 : index
    %c0_96 = arith.constant 0 : index
    %213 = vector.load %arg7[%c0_95, %c10, %c0_96] : memref<1x24x128xf32, #tpu.memory_space<vmem>>, vector<1x1x32xf32>
    %214 = vector.shape_cast %213 : vector<1x1x32xf32> to vector<1x32xf32>
    %c0_97 = arith.constant 0 : index
    %c11 = arith.constant 11 : index
    %c0_98 = arith.constant 0 : index
    %215 = vector.load %arg7[%c0_97, %c11, %c0_98] : memref<1x24x128xf32, #tpu.memory_space<vmem>>, vector<1x1x32xf32>
    %216 = vector.shape_cast %215 : vector<1x1x32xf32> to vector<1x32xf32>
    %cst_99 = arith.constant dense<0.000000e+00> : vector<8xf32>
    %217 = vector.multi_reduction <add>, %212, %cst_99 [1] : vector<8x32xf32> to vector<8xf32>
    %218 = vector.shape_cast %217 : vector<8xf32> to vector<8x1xf32>
    %cst_100 = arith.constant 3.200000e+01 : f32
    %219 = vector.broadcast %cst_100 : f32 to vector<8x1xf32>
    %220 = arith.divf %218, %219 : vector<8x1xf32>
    %221 = vector.broadcast %220 : vector<8x1xf32> to vector<8x32xf32>
    %222 = arith.subf %212, %221 : vector<8x32xf32>
    %223 = arith.mulf %222, %222 : vector<8x32xf32>
    %cst_101 = arith.constant dense<0.000000e+00> : vector<8xf32>
    %224 = vector.multi_reduction <add>, %223, %cst_101 [1] : vector<8x32xf32> to vector<8xf32>
    %225 = vector.shape_cast %224 : vector<8xf32> to vector<8x1xf32>
    %cst_102 = arith.constant 3.200000e+01 : f32
    %226 = vector.broadcast %cst_102 : f32 to vector<8x1xf32>
    %227 = arith.divf %225, %226 : vector<8x1xf32>
    %cst_103 = arith.constant 9.99999974E-6 : f32
    %228 = vector.broadcast %cst_103 : f32 to vector<8x1xf32>
    %229 = arith.addf %227, %228 : vector<8x1xf32>
    %230 = math.rsqrt %229 : vector<8x1xf32>
    %231 = vector.broadcast %230 : vector<8x1xf32> to vector<8x32xf32>
    %232 = arith.mulf %222, %231 : vector<8x32xf32>
    %233 = vector.broadcast %214 : vector<1x32xf32> to vector<8x32xf32>
    %234 = arith.mulf %232, %233 : vector<8x32xf32>
    %235 = vector.broadcast %216 : vector<1x32xf32> to vector<8x32xf32>
    %236 = arith.addf %234, %235 : vector<8x32xf32>
    %c0_104 = arith.constant 0 : index
    %c256 = arith.constant 256 : index
    %c0_105 = arith.constant 0 : index
    %237 = vector.load %arg6[%c0_104, %c256, %c0_105] : memref<1x352x128xf32, #tpu.memory_space<vmem>>, vector<1x32x64xf32>
    %238 = vector.shape_cast %237 : vector<1x32x64xf32> to vector<32x64xf32>
    %cst_106 = arith.constant dense<0.000000e+00> : vector<8x64xf32>
    %239 = tpu.matmul %236, %238, %cst_106 {dimension_numbers = #tpu.dot_dimension_numbers<[1], [0], [0], [1], [0, 0, 1, 1], [], []>} : vector<8x32xf32>, vector<32x64xf32>, vector<8x64xf32> -> vector<8x64xf32>
    %c0_107 = arith.constant 0 : index
    %c14 = arith.constant 14 : index
    %c0_108 = arith.constant 0 : index
    %240 = vector.load %arg7[%c0_107, %c14, %c0_108] : memref<1x24x128xf32, #tpu.memory_space<vmem>>, vector<1x1x64xf32>
    %241 = vector.shape_cast %240 : vector<1x1x64xf32> to vector<1x64xf32>
    %242 = vector.broadcast %241 : vector<1x64xf32> to vector<8x64xf32>
    %243 = arith.addf %239, %242 : vector<8x64xf32>
    %cst_109 = arith.constant 0.000000e+00 : f32
    %244 = vector.broadcast %cst_109 : f32 to vector<8x64xf32>
    %245 = arith.maximumf %243, %244 : vector<8x64xf32>
    %c0_110 = arith.constant 0 : index
    %c288 = arith.constant 288 : index
    %c0_111 = arith.constant 0 : index
    %246 = vector.load %arg6[%c0_110, %c288, %c0_111] : memref<1x352x128xf32, #tpu.memory_space<vmem>>, vector<1x64x32xf32>
    %247 = vector.shape_cast %246 : vector<1x64x32xf32> to vector<64x32xf32>
    %cst_112 = arith.constant dense<0.000000e+00> : vector<8x32xf32>
    %248 = tpu.matmul %245, %247, %cst_112 {dimension_numbers = #tpu.dot_dimension_numbers<[1], [0], [0], [1], [0, 0, 1, 1], [], []>} : vector<8x64xf32>, vector<64x32xf32>, vector<8x32xf32> -> vector<8x32xf32>
    %c0_113 = arith.constant 0 : index
    %c15 = arith.constant 15 : index
    %c0_114 = arith.constant 0 : index
    %249 = vector.load %arg7[%c0_113, %c15, %c0_114] : memref<1x24x128xf32, #tpu.memory_space<vmem>>, vector<1x1x32xf32>
    %250 = vector.shape_cast %249 : vector<1x1x32xf32> to vector<1x32xf32>
    %251 = vector.broadcast %250 : vector<1x32xf32> to vector<8x32xf32>
    %252 = arith.addf %248, %251 : vector<8x32xf32>
    %253 = arith.addf %236, %252 : vector<8x32xf32>
    %c0_115 = arith.constant 0 : index
    %c12 = arith.constant 12 : index
    %c0_116 = arith.constant 0 : index
    %254 = vector.load %arg7[%c0_115, %c12, %c0_116] : memref<1x24x128xf32, #tpu.memory_space<vmem>>, vector<1x1x32xf32>
    %255 = vector.shape_cast %254 : vector<1x1x32xf32> to vector<1x32xf32>
    %c0_117 = arith.constant 0 : index
    %c13 = arith.constant 13 : index
    %c0_118 = arith.constant 0 : index
    %256 = vector.load %arg7[%c0_117, %c13, %c0_118] : memref<1x24x128xf32, #tpu.memory_space<vmem>>, vector<1x1x32xf32>
    %257 = vector.shape_cast %256 : vector<1x1x32xf32> to vector<1x32xf32>
    %cst_119 = arith.constant dense<0.000000e+00> : vector<8xf32>
    %258 = vector.multi_reduction <add>, %253, %cst_119 [1] : vector<8x32xf32> to vector<8xf32>
    %259 = vector.shape_cast %258 : vector<8xf32> to vector<8x1xf32>
    %cst_120 = arith.constant 3.200000e+01 : f32
    %260 = vector.broadcast %cst_120 : f32 to vector<8x1xf32>
    %261 = arith.divf %259, %260 : vector<8x1xf32>
    %262 = vector.broadcast %261 : vector<8x1xf32> to vector<8x32xf32>
    %263 = arith.subf %253, %262 : vector<8x32xf32>
    %264 = arith.mulf %263, %263 : vector<8x32xf32>
    %cst_121 = arith.constant dense<0.000000e+00> : vector<8xf32>
    %265 = vector.multi_reduction <add>, %264, %cst_121 [1] : vector<8x32xf32> to vector<8xf32>
    %266 = vector.shape_cast %265 : vector<8xf32> to vector<8x1xf32>
    %cst_122 = arith.constant 3.200000e+01 : f32
    %267 = vector.broadcast %cst_122 : f32 to vector<8x1xf32>
    %268 = arith.divf %266, %267 : vector<8x1xf32>
    %cst_123 = arith.constant 9.99999974E-6 : f32
    %269 = vector.broadcast %cst_123 : f32 to vector<8x1xf32>
    %270 = arith.addf %268, %269 : vector<8x1xf32>
    %271 = math.rsqrt %270 : vector<8x1xf32>
    %272 = vector.broadcast %271 : vector<8x1xf32> to vector<8x32xf32>
    %273 = arith.mulf %263, %272 : vector<8x32xf32>
    %274 = vector.broadcast %255 : vector<1x32xf32> to vector<8x32xf32>
    %275 = arith.mulf %273, %274 : vector<8x32xf32>
    %276 = vector.broadcast %257 : vector<1x32xf32> to vector<8x32xf32>
    %277 = arith.addf %275, %276 : vector<8x32xf32>
    %c0_124 = arith.constant 0 : index
    %c0_125 = arith.constant 0 : index
    %278 = vector.load %arg9[%c0_124, %c0_125] : memref<8x32xf32, #tpu.memory_space<vmem>>, vector<8x32xf32>
    tpu.vector_store %arg9[%c0_124, %c0_125], %277 {strides = array<i32>} : memref<8x32xf32, #tpu.memory_space<vmem>>, vector<8x32xf32>,
    %c0_126 = arith.constant 0 : index
    %c16 = arith.constant 16 : index
    %c0_127 = arith.constant 0 : index
    %279 = vector.load %arg7[%c0_126, %c16, %c0_127] : memref<1x24x128xf32, #tpu.memory_space<vmem>>, vector<1x1x32xf32>
    %280 = vector.shape_cast %279 : vector<1x1x32xf32> to vector<1x32xf32>
    %c0_128 = arith.constant 0 : index
    %c17 = arith.constant 17 : index
    %c0_129 = arith.constant 0 : index
    %281 = vector.load %arg7[%c0_128, %c17, %c0_129] : memref<1x24x128xf32, #tpu.memory_space<vmem>>, vector<1x1x32xf32>
    %282 = vector.shape_cast %281 : vector<1x1x32xf32> to vector<1x32xf32>
    %cst_130 = arith.constant dense<0.000000e+00> : vector<8xf32>
    %283 = vector.multi_reduction <add>, %277, %cst_130 [1] : vector<8x32xf32> to vector<8xf32>
    %284 = vector.shape_cast %283 : vector<8xf32> to vector<8x1xf32>
    %cst_131 = arith.constant 3.200000e+01 : f32
    %285 = vector.broadcast %cst_131 : f32 to vector<8x1xf32>
    %286 = arith.divf %284, %285 : vector<8x1xf32>
    %287 = vector.broadcast %286 : vector<8x1xf32> to vector<8x32xf32>
    %288 = arith.subf %277, %287 : vector<8x32xf32>
    %289 = arith.mulf %288, %288 : vector<8x32xf32>
    %cst_132 = arith.constant dense<0.000000e+00> : vector<8xf32>
    %290 = vector.multi_reduction <add>, %289, %cst_132 [1] : vector<8x32xf32> to vector<8xf32>
    %291 = vector.shape_cast %290 : vector<8xf32> to vector<8x1xf32>
    %cst_133 = arith.constant 3.200000e+01 : f32
    %292 = vector.broadcast %cst_133 : f32 to vector<8x1xf32>
    %293 = arith.divf %291, %292 : vector<8x1xf32>
    %cst_134 = arith.constant 9.99999974E-6 : f32
    %294 = vector.broadcast %cst_134 : f32 to vector<8x1xf32>
    %295 = arith.addf %293, %294 : vector<8x1xf32>
    %296 = math.rsqrt %295 : vector<8x1xf32>
    %297 = vector.broadcast %296 : vector<8x1xf32> to vector<8x32xf32>
    %298 = arith.mulf %288, %297 : vector<8x32xf32>
    %299 = vector.broadcast %280 : vector<1x32xf32> to vector<8x32xf32>
    %300 = arith.mulf %298, %299 : vector<8x32xf32>
    %301 = vector.broadcast %282 : vector<1x32xf32> to vector<8x32xf32>
    %302 = arith.addf %300, %301 : vector<8x32xf32>
    %c0_135 = arith.constant 0 : index
    %c0_136 = arith.constant 0 : index
    %c0_137 = arith.constant 0 : index
    %c0_138 = arith.constant 0 : index
    %303 = vector.load %arg8[%c0_135, %c0_136, %c0_137, %c0_138] : memref<1x1x8x32xf32, #tpu.memory_space<vmem>>, vector<1x1x8x32xf32>
    %304 = vector.shape_cast %303 : vector<1x1x8x32xf32> to vector<8x32xf32>
    %305 = vector.shape_cast %302 : vector<8x32xf32> to vector<1x1x8x32xf32>
    tpu.vector_store %arg8[%c0_135, %c0_136, %c0_137, %c0_138], %305 {strides = array<i32>} : memref<1x1x8x32xf32, #tpu.memory_space<vmem>>, vector<1x1x8x32xf32>,
    return
  }
  func.func @transform_0(%arg0: i32, %arg1: i32) -> (i32, i32, i32) {
    %c0_i32 = arith.constant 0 : i32
    %c0_i32_0 = arith.constant 0 : i32
    %c0_i32_1 = arith.constant 0 : i32
    return %arg0, %c0_i32, %c0_i32_0 : i32, i32, i32
  }
  func.func @transform_1(%arg0: i32, %arg1: i32) -> (i32, i32, i32) {
    %c0_i32 = arith.constant 0 : i32
    %c0_i32_0 = arith.constant 0 : i32
    %c0_i32_1 = arith.constant 0 : i32
    return %arg0, %c0_i32, %c0_i32_0 : i32, i32, i32
  }
  func.func @transform_2(%arg0: i32, %arg1: i32) -> (i32, i32, i32) {
    %c0_i32 = arith.constant 0 : i32
    %c0_i32_0 = arith.constant 0 : i32
    %c0_i32_1 = arith.constant 0 : i32
    return %arg0, %c0_i32, %c0_i32_0 : i32, i32, i32
  }
  func.func @transform_3(%arg0: i32, %arg1: i32) -> (i32, i32, i32) {
    %c0_i32 = arith.constant 0 : i32
    %c0_i32_0 = arith.constant 0 : i32
    %c0_i32_1 = arith.constant 0 : i32
    return %arg0, %c0_i32, %c0_i32_0 : i32, i32, i32
  }
  func.func @transform_4(%arg0: i32, %arg1: i32) -> (i32, i32, i32) {
    %c0_i32 = arith.constant 0 : i32
    %c0_i32_0 = arith.constant 0 : i32
    %c0_i32_1 = arith.constant 0 : i32
    return %arg1, %c0_i32, %c0_i32_0 : i32, i32, i32
  }
  func.func @transform_5(%arg0: i32, %arg1: i32) -> (i32, i32, i32) {
    %c0_i32 = arith.constant 0 : i32
    %c0_i32_0 = arith.constant 0 : i32
    %c0_i32_1 = arith.constant 0 : i32
    return %arg1, %c0_i32, %c0_i32_0 : i32, i32, i32
  }
  func.func @transform_6(%arg0: i32, %arg1: i32) -> (i32, i32, i32, i32) {
    %c0_i32 = arith.constant 0 : i32
    %c0_i32_0 = arith.constant 0 : i32
    %c0_i32_1 = arith.constant 0 : i32
    return %arg1, %arg0, %c0_i32, %c0_i32_0 : i32, i32, i32, i32
  }
}

</mosaic_0001>

<bundles_post_ra>
// kernel: transformer_decoder_clip.1
= control target key start
LH: loop header
LB: loop body
LE: loop exit
PB: predicated region body
PF: predicated region fallthrough
CT: control target
= control target key end

     0   :  { %s2383_s0 = inlined_call_operand.vmem [shape: f32[2,8,32], index: 0, kind: input, shape index: {}]   ;;  %s2384_s1 = inlined_call_operand.vmem [shape: f32[2,8,32], index: 1, kind: input, shape index: {}]   ;;  %s2385_s2 = inlined_call_operand.vmem [shape: f32[2,16,32], index: 2, kind: input, shape index: {}]   ;;  %s2386_s3 = inlined_call_operand.vmem [shape: f32[2,16,32], index: 3, kind: input, shape index: {}]   ;;  %s2387_s4 = inlined_call_operand.hbm [shape: f32[3,352,128], index: 4, kind: input, shape index: {}]   ;;  %s2388_s5 = inlined_call_operand.vmem [shape: f32[3,24,128], index: 5, kind: input, shape index: {}]   ;;  %s2389_s6 = inlined_call_operand.vmem [shape: f32[3,2,8,32], index: 6, kind: output, shape index: {}]  }
   0x1   :  { %2393 = sst [smem:[#allocation11_spill]] %s2387_s4 }
   0x2   :  { %11 = vsyncpa [#allocation4], 0 }
   0x3   :  { %13 = vsyncpa [#allocation4 + $0x1], 0  ;;  %s2024_s21 = smov 0   ;;  %s2026_s22 = smov 0  }
   0x4   :  { %s2028_s23 = smov 0   ;;  %s2030_s24 = smov 0  }
   0x5   :  { %s2032_s25 = smov 0   ;;  %s2034_s26 = smov 0  }
   0x6   :  { %s2036_s27 = smov 0   ;;  %s2038_s28 = smov 0  }
   0x7 LB: > { %2394 = sst [smem:[#allocation6_spill]] %s1970_s26  ;;  %s1663_s29 = sadd.s32 4294967295, %s1978_s28   ;;  %s1978_s28 = sphi %s2038_s28, %s19_s28   ;;  %s1974_s27 = sphi %s2036_s27, %s2405_s27   ;;  %s1970_s26 = sphi %s2034_s26, %s2404_s26   ;;  %s1966_s25 = sphi %s2032_s25, %s2403_s25   ;;  %s1962_s24 = sphi %s2030_s24, %s2402_s24   ;;  %s1958_s23 = sphi %s2028_s23, %s2408_s23   ;;  %s1954_s22 = sphi %s2026_s22, %s2407_s22   ;;  %s1950_s21 = sphi %s2024_s21, %s2406_s21  }
   0x8   : > { %2395 = sst [smem:[#allocation7_spill]] %s1974_s27  ;;  %s28_s30 = sadd.s32 1, %s1970_s26 }
   0x9   : > { %p29_p0 = scmp.ge.s32.totalorder %s28_s30, 3  ;;  %s31_s7 = sadd.s32 1, %s1974_s27 }
   0xa   : > { %s142_s8 = sadd.s32 1, %s1958_s23  ;;  %p149_p1 = scmp.ne.s32.totalorder %s1958_s23, %s1954_s22 }
   0xb   : > { %s2410_s30 = smov (%p29_p0, %s28_s30), 0  ;;  %s2412_s7 = smov (!%p29_p0, %s31_s7), %s1974_s27 }
   0xc   : > { %2396 = sst [smem:[#allocation8_spill]] %s2410_s30  ;;  %s139_s9 = ssub.s32 %s1970_s26, %s2410_s30 }
   0xd   : > { %p150_p2 = scmp.eq.s32.totalorder %s1978_s28, 0  ;;  %p33_p3 = scmp.ge.s32.totalorder %s2412_s7, 2 }
   0xe   : > { %p140_p4 = scmp.eq.s32.totalorder %s139_s9, 0  ;;  %p155_p6 = scmp.ne.s32.totalorder %s1954_s22, %s1950_s21 }
   0xf   : > { %p151_p5 = por %p150_p2, %p149_p1  ;;  %s2414_s7 = smov (%p33_p3, %s2412_s7), 0 }
  0x10   : > { %2397 = sst [smem:[#allocation9_spill]] %s2414_s7  ;;  %p156_p7 = scmp.eq.s32.totalorder %s1663_s29, 0 }
  0x11   : > { %s2078_s10 = scalar_select %p140_p4, %s1958_s23, %s142_s8  }
  0x12   : > { %p1733_p8 = scmp.lt.s32.totalorder %s1978_s28, 6  ;;  %s263_s11 = sand.u32 1, %s1958_s23  }
  0x13   : > { %2398 = sst [smem:[#allocation10_spill]] %s2078_s10  ;;  %p2082_p9 = por %p156_p7, %p155_p6 }
  0x14   : > { %s1723_s13 = smul.u32 352, %s263_s11  ;;  %p1730_p10 = pnand %p1733_p8, %p151_p5 }
  0x15   : > { %s1724_s14 = smul.u32 352, %s1970_s26  ;;  %s2400_s4 = sld [smem:[#allocation11_spill]] }
  0x16   : > { %s267_s18 = scalar_lea.vmem [#allocation3], %s1723_s13  ;;  %s264_s21 = scalar_lea.sflag [#allocation4], %s263_s11 }
  0x17   : > { %s275_s19 = sshll.u32 %s267_s18, 4  ;;  %s1980_s29 = smov 128   ;;  %s276_s19 = int_to_ptr.vmem [resolvable:$true] %s275_s19 }
  0x18   : > { %s1981_s8 = smov 8   ;;  %p1668_p11 = scmp.ge.s32.totalorder %s1978_s28, 1 }
  0x19   : > { %p291_p12 = scmp.lt.s32.totalorder %s1978_s28, 7 }
  0x1b   : > { %s272_s17 = scalar_lea.hbm %s2400_s4, %s1724_s14  ;;  %p292_p13 = pnand %p1668_p11, %p291_p12 }
  0x1c   : > { %s273_s20 = sshll.u32 %s272_s17, 4  ;;  %s297_s9 = sand.u32 (!%p292_p13), 1, %s1954_s22   ;;  %s274_s20 = int_to_ptr.hbm [resolvable:$true] %s273_s20 }
  0x1d   : > { %1732 = dma.hbm_to_vmem [thread:$0]  (!%p1730_p10), %s274_s20, 5632, %s276_s19, %s264_s21, %s1980_s29, %s1980_s29, %s1981_s8  }
  0x1e   : > { %295 = sbr.rel (%p292_p13) target bundleno = 3764 (0xeb4), region = 44  ;;  %s298_s30 = scalar_lea.sflag (!%p292_p13), [#allocation4], %s297_s9 }
  0x1f   : > { %s1725_s7 = smul.u32 (!%p292_p13), 352, %s297_s9 }
  0x21   : > { %s2093_s15 = scalar_lea.vmem (!%p292_p13), [#allocation3], %s1725_s7 }
  0x23   : > { %1945 = dma.done.wait (%p2082_p9), %s298_s30, 5632  }
  0x24   : > { %1947 = vsyncadd (%p2082_p9), %s298_s30, 4294961664  ;;  %p357_p0 = scmp.lt.s32.totalorder %s1966_s25, 1  ;;  %p375_p1 = scmp.lt.s32.totalorder %s1962_s24, 2 }
  0x25   : > { %p1678_p2 = scmp.ne.s32.totalorder %s1962_s24, 0 }
  0x26   : > { %s2416_s25 = smov (!%p357_p0, %s1966_s25), 1 }
  0x27   : > { %s376_s11 = scalar_select %p375_p1, %s1962_s24, 2 }
  0x28   : > { %s1669_s13 = sshll.u32 %s2416_s25, 3  ;;  %s1721_s14 = sshll.u32 %s2416_s25, 4 }
  0x29   : > { %s360_s7 = scalar_lea.vmem %s2383_s0, %s1669_s13  ;;  %s364_s20 = scalar_lea.vmem %s2384_s1, %s1669_s13 }
  0x2a   : > { %s2112_s21 = scalar_lea.vmem %s2385_s2, %s1721_s14  ;;  %s2117_s9 = scalar_lea.vmem %s2386_s3, %s1721_s14 }
  0x2b   : > { %s1726_s4 = smul.u32 24, %s376_s11  ;;  %s1676_s27 = sshll.u32 %s376_s11, 1 }
  0x2c   : > { %s385_s26 = sadd.s32 %s1676_s27, %s2416_s25  ;;  %391 = sbr.rel (%p1678_p2) target bundleno = 51 (0x33), region = 52 }
  0x2d   : > { %s2122_s17 = scalar_lea.vmem %s2388_s5, %s1726_s4  ;;  %s1677_s18 = sshll.u32 %s385_s26, 3 }
  0x2e   : > { %s2127_s12 = scalar_lea.vmem %s2389_s6, %s1677_s18 }
  0x31   : > { %v392_v0 = vld [vmem:[%s360_s7] sm:$0xff]  ;;  %vm393_vm0 = vcmask 261120  }
  0x32   : > { %394 = vst.msk [vmem:[#allocation2] sm:$0xff] %vm393_vm0, %v392_v0 }
  0x33 PF: > { %v436_v1 = vld [vmem:[%s2093_s15 + $0x38] sm:$0xff]  ;;  %v435_v3 = vld [vmem:[%s2093_s15 + $0x30] sm:$0xff]  ;;  %v434_v5 = vld [vmem:[%s2093_s15 + $0x28] sm:$0xff]  ;;  %vm408_vm1 = vcmask 261120   ;;  %vm488_vm2 = vcmask 64512   ;;  %s1982_s4 = smov 120  }
  0x34   : > { %v405_v2 = vld [vmem:[%s2093_s15 + $0x18] sm:$0xff]  ;;  %451 = vmatpush.msra.mxu1 %v436_v1  ;;  %v404_v4 = vld [vmem:[%s2093_s15 + $0x10] sm:$0xff]  ;;  %v403_v6 = vld [vmem:[%s2093_s15 + $0x8] sm:$0xff]  ;;  %s1983_s24 = smov 112   ;;  %s1984_s25 = smov 104  }
  0x35   : > { %424 = vmatpush.msra.mxu0 %v405_v2  ;;  %v2138_v8 = vld [vmem:[%s364_s20] sm:$0xff]  ;;  %v461_v10 = vld [vmem:[%s2093_s15 + $0x50] sm:$0xff]  ;;  %v433_v11 = vld [vmem:[%s2093_s15 + $0x20] sm:$0xff]  ;;  %s1985_s26 = smov 8   ;;  %s1986_s27 = smov 24  }
  0x36   : > { %452 = vmatpush.msra.mxu1 %v435_v3  ;;  %v462_v9 = vld [vmem:[%s2093_s15 + $0x58] sm:$0xff]  ;;  %v402_v12 = vld [vmem:[%s2093_s15] sm:$0xff]  ;;  %v460_v14 = vld [vmem:[%s2093_s15 + $0x48] sm:$0xff]  ;;  %s1987_s10 = smov 16  }
  0x37   : > { %425 = vmatpush.msra.mxu0 %v404_v4  ;;  %480 = vmatpush.msra.mxu2 %v462_v9  ;;  %v459_v15 = vld [vmem:[%s2093_s15 + $0x40] sm:$0xff]  ;;  %v1822_v16 = vld [vmem:[%s2122_s17 + $0x1] ss:$0 sm:$0xff]  ;;  %v1823_v17 = vld [vmem:[%s2122_s17] ss:$0 sm:$0xff] }
  0x38   : > { %453 = vmatpush.msra.mxu1 %v434_v5  ;;  %v1824_v23 = vld [vmem:[%s2122_s17 + $0x2] ss:$0 sm:$0xff] }
  0x39   : > { %v2136_v7 = vld [vmem:[#allocation2] sm:$0xff]  ;;  %426 = vmatpush.msra.mxu0 %v403_v6  ;;  %481 = vmatpush.msra.mxu2 %v461_v10 }
  0x3a   : > { %v401_v13 = vadd.f32 %v2138_v8, %v2136_v7  ;;  %454 = vmatpush.msra.mxu1 %v433_v11 }
  0x3b   : > { %427 = vmatpush.msra.mxu0 %v402_v12  ;;  %482 = vmatpush.msra.mxu2 %v460_v14 }
  0x3c   : > { %1680 = vmatmul.msk.f32.vlgmr.msra.gmra.mxu1 %vm408_vm1, %v401_v13  ;;  %1679 = vmatmul.msk.f32.vlgmr.msra.gmra.mxu0 %vm408_vm1, %v401_v13 }
  0x3d   : > { %483 = vmatpush.msra.mxu2 %v459_v15 }
  0x3e   : > { %1681 = vmatmul.msk.f32.vlgmr.msra.gmra.mxu2 %vm408_vm1, %v2136_v7 }
  0xb9   : > { %v456_v18 = vpop.f32.mrf.mxu1  ;;  %v429_v19 = vpop.f32.mrf.mxu0 }
  0xba   : > { %v457_v20 = vadd.f32 %v1822_v16, %v456_v18  ;;  %v430_v21 = vadd.f32 %v1823_v17, %v429_v19 }
  0xbc   : > { %v432_v22 = vmul.f32 0.35355338, %v430_v21  ;;  %564 = vrot.lane.b32.xlu2 %v457_v20, %s1982_s4  ;;  %643 = vrot.lane.b32.xlu1 %v457_v20, %s1983_s24 }
  0xbd   : > { %1682 = vmatpush.xpose.msk.msra.mxu3 %vm488_vm2, %v457_v20 }
  0xc0   : > { %1683 = vmatmul.msk.f32.vlgmr.msra.gmra.mxu3 %vm488_vm2, %v432_v22 }
  0xc1   : > { %v485_v24 = vpop.f32.mrf.mxu2 }
  0xc2   : > { %v2162_v25 = vadd.f32 %v1824_v23, %v485_v24 }
  0xc4   : > { %562 = vrot.lane.b32.xlu2 %v432_v22, %s1982_s4  ;;  %641 = vrot.lane.b32.xlu1 %v432_v22, %s1983_s24 }
  0xc5   : > { %557 = vmatpush.msrb.mxu3 %v2162_v25 }
  0xcc   : > { %719 = vrot.lane.b32.xlu1 %v432_v22, %s1984_s25 }
 0x116   : > { %v565_v26 = vpop.permute.xlu2 %564 }
 0x117   : > { %1685 = vmatpush.xpose.msk.msrb.mxu0 %vm488_vm2, %v565_v26 }
 0x11e   : > { %v563_v27 = vpop.permute.xlu2 %562 }
 0x11f   : > { %1686 = vmatmul.msk.f32.vlgmr.msrb.gmra.mxu0 %vm488_vm2, %v563_v27 }
 0x12e   : > { %v644_v28 = vpop.permute.xlu1 %643 }
 0x12f   : > { %1688 = vmatpush.xpose.msk.msra.mxu3 %vm488_vm2, %v644_v28 }
 0x136   : > { %v642_v48 = vpop.permute.xlu1 %641 }
 0x13e   : > { %v720_v57 = vpop.permute.xlu1 %719 }
 0x143   : > { %v512_v29 = vpop.f32.mrf.mxu3 }
 0x144   : > { %v515_v30 = vsel %vm488_vm2, %v512_v29, -inf }
 0x145   : > { %516 = vmax.xlane.f32.xlu0 %v515_v30 }
 0x19c   : > { %v587_v31 = vpop.f32.mrf.mxu0 }
 0x19d   : > { %v590_v32 = vsel %vm488_vm2, %v587_v31, -inf }
 0x19e   : > { %591 = vmax.xlane.f32.xlu2 %v590_v32 }
 0x1b8   : > { %v517_v33 = vpop.xlane.xlu0 %516 }
 0x1b9   : > { %v518_v34 = vsub.f32 %v512_v29, %v517_v33 }
 0x1bb   : > { %v519_v35 = vmul.f32 1.442695, %v518_v34 }
 0x1bd   : > { %1840 = vpow2.f32 %v519_v35 }
 0x1c3   : > { %v1841_v36 = vpop.eup %1840 }
 0x1c4   : > { %v521_v37 = vsel %vm488_vm2, %v1841_v36, 0.0 }
 0x1c5   : > { %522 = vadd.xlane.f32.xlu0 %v521_v37 }
 0x1d9   : > { %721 = vrot.lane.b32.xlu0 %v457_v20, %s1984_s25 }
 0x211   : > { %v592_v38 = vpop.xlane.xlu2 %591 }
 0x212   : > { %v593_v39 = vsub.f32 %v587_v31, %v592_v38 }
 0x214   : > { %v594_v40 = vmul.f32 1.442695, %v593_v39 }
 0x216   : > { %1842 = vpow2.f32 %v594_v40 }
 0x21c   : > { %v2172_v41 = vpop.eup %1842 }
 0x21d   : > { %v596_v42 = vsel %vm488_vm2, %v2172_v41, 0.0 }
 0x21e   : > { %597 = vadd.xlane.f32.xlu2 %v596_v42 }
 0x238   : > { %v523_v43 = vpop.xlane.xlu0 %522 }
 0x239   : > { %1844 = vrcp.f32 %v523_v43  ;;  %v535_v47 = vand.u32 2147483648, %v523_v43  ;;  %v533_v50 = vand.u32 2147483647, %v523_v43  ;;  %vm529_vm4 = vweird.f32 %v523_v43 }
 0x23b   : > { %v536_v52 = vor.u32 1.1754944e-38, %v535_v47  ;;  %vm534_vm6 = vcmp.eq.f32.partialorder %v533_v50, 8.507059e+37 }
 0x23f   : > { %v1845_v44 = vpop.eup %1844 }
 0x240   : > { %v525_v45 = vmul.f32 %v1845_v44, %v523_v43  ;;  %vm530_vm3 = vweird.f32 %v1845_v44 }
 0x241   : > { %vm531_vm5 = vmor %vm529_vm4, %vm530_vm3 }
 0x242   : > { %v526_v46 = vsub.f32 1.0, %v525_v45 }
 0x244   : > { %v527_v49 = vmul.f32 %v1845_v44, %v526_v46 }
 0x246   : > { %v528_v51 = vadd.f32 %v1845_v44, %v527_v49 }
 0x248   : > { %v532_v53 = vsel %vm531_vm5, %v1845_v44, %v528_v51  ;;  %vm810_vm5 = vcmask 130048  }
 0x249   : > { %v537_v54 = vsel %vm534_vm6, %v536_v52, %v532_v53  ;;  %v817_v53 = vld [vmem:[%s2093_s15 + $0x78] sm:$0xff]  ;;  %vm812_vm6 = vcmask 195584  }
 0x24a   : > { %v538_v55 = vmul.f32 %v1841_v36, %v537_v54  ;;  %v816_v54 = vld [vmem:[%s2093_s15 + $0x70] sm:$0xff]  ;;  %835 = vmatpush.msrb.mxu2 %v817_v53 }
 0x24b   : > { %v722_v56 = vpop.permute.xlu0 %721 }
 0x24c   : > { %1684 = vmatmul.msk.f32.vlgmr.msrb.gmra.mxu3 %vm488_vm2, %v538_v55  ;;  %1691 = vmatpush.xpose.msk.msra.mxu0 %vm488_vm2, %v722_v56  ;;  %v815_v55 = vld [vmem:[%s2093_s15 + $0x68] sm:$0xff]  ;;  %v814_v56 = vld [vmem:[%s2093_s15 + $0x60] sm:$0xff] }
 0x24d   : > { %836 = vmatpush.msrb.mxu2 %v816_v54 }
 0x24f   : > { %1692 = vmatmul.msk.f32.vlgmr.msra.gmra.mxu0 %vm488_vm2, %v720_v57  ;;  %837 = vmatpush.msrb.mxu2 %v815_v55 }
 0x251   : > { %838 = vmatpush.msrb.mxu2 %v814_v56 }
 0x254   : > { %1689 = vmatmul.msk.f32.vlgmr.msra.gmra.mxu3 %vm488_vm2, %v642_v48 }
 0x291   : > { %v598_v11 = vpop.xlane.xlu2 %597 }
 0x292   : > { %v610_v20 = vand.u32 2147483648, %v598_v11  ;;  %vm604_vm8 = vweird.f32 %v598_v11  ;;  %v608_v22 = vand.u32 2147483647, %v598_v11 }
 0x294   : > { %v611_v26 = vor.u32 1.1754944e-38, %v610_v20  ;;  %vm609_vm10 = vcmp.eq.f32.partialorder %v608_v22, 8.507059e+37 }
 0x2cc   : > { %v744_v58 = vpop.f32.mrf.mxu0 }
 0x2cd   : > { %v747_v59 = vsel %vm488_vm2, %v744_v58, -inf }
 0x2ce   : > { %748 = vmax.xlane.f32.xlu0 %v747_v59 }
 0x2cf   : > { %v2181_v60 = vpop.f32.mrf.mxu3 }
 0x2d7   : > { %v666_v61 = vpop.f32.mrf.mxu3 }
 0x2d8   : > { %v669_v62 = vsel %vm488_vm2, %v666_v61, -inf }
 0x2d9   : > { %670 = vmax.xlane.f32.xlu1 %v669_v62 }
 0x2e2   : > { %771 = vrot.lane.b32.xlu0 %v2162_v25, %s1984_s25 }
 0x341   : > { %v749_v63 = vpop.xlane.xlu0 %748 }
 0x342   : > { %v750_v0 = vsub.f32 %v744_v58, %v749_v63 }
 0x344   : > { %v751_v1 = vmul.f32 1.442695, %v750_v0  ;;  %v1825_v0 = vld [vmem:[%s2122_s17 + $0x3] ss:$0 sm:$0xff] }
 0x346   : > { %1846 = vpow2.f32 %v751_v1 }
 0x34c   : > { %v2186_v2 = vpop.eup %1846  ;;  %v671_v3 = vpop.xlane.xlu1 %670 }
 0x34d   : > { %v672_v4 = vsub.f32 %v666_v61, %v671_v3  ;;  %v753_v5 = vsel %vm488_vm2, %v2186_v2, 0.0 }
 0x34e   : > { %754 = vadd.xlane.f32.xlu1 %v753_v5  ;;  %v915_v5 = vld [vmem:[%s2093_s15 + $0xb8] sm:$0xff] }
 0x34f   : > { %v673_v6 = vmul.f32 1.442695, %v672_v4  ;;  %936 = vmatpush.msrb.mxu0 %v915_v5  ;;  %v947_v5 = vld [vmem:[%s2093_s15 + $0xc0] sm:$0xff] }
 0x351   : > { %1848 = vpow2.f32 %v673_v6  ;;  %v914_v6 = vld [vmem:[%s2093_s15 + $0xb0] sm:$0xff] }
 0x352   : > { %1850 = vrcp.f32 %v598_v11  ;;  %937 = vmatpush.msrb.mxu0 %v914_v6 }
 0x354   : > { %v772_v35 = vpop.permute.xlu0 %771 }
 0x357   : > { %v2190_v9 = vpop.eup %1848 }
 0x358   : > { %v675_v10 = vsel %vm488_vm2, %v2190_v9, 0.0  ;;  %v1851_v12 = vpop.eup %1850 }
 0x359   : > { %676 = vadd.xlane.f32.xlu2 %v675_v10  ;;  %v600_v13 = vmul.f32 %v1851_v12, %v598_v11  ;;  %vm605_vm7 = vweird.f32 %v1851_v12  ;;  %v399_v10 = vld [vmem:[%s2117_s9] sm:$0xff]  ;;  %v913_v11 = vld [vmem:[%s2093_s15 + $0xa8] sm:$0xff] }
 0x35a   : > { %vm606_vm9 = vmor %vm604_vm8, %vm605_vm7  ;;  %938 = vmatpush.msrb.mxu0 %v913_v11 }
 0x35b   : > { %v601_v15 = vsub.f32 1.0, %v600_v13  ;;  %v912_v13 = vld [vmem:[%s2093_s15 + $0xa0] sm:$0xff] }
 0x35c   : > { %939 = vmatpush.msrb.mxu0 %v912_v13 }
 0x35d   : > { %v602_v16 = vmul.f32 %v1851_v12, %v601_v15  ;;  %v2230_v15 = vld [vmem:[%s2112_s21 + $0x8] sm:$0xff] }
 0x35f   : > { %v603_v19 = vadd.f32 %v1851_v12, %v602_v16  ;;  %v400_v16 = vld [vmem:[%s2117_s9 + $0x8] sm:$0xff] }
 0x367   : > { %693 = vrot.lane.b32.xlu1 %v2162_v25, %s1983_s24 }
 0x371   : > { %615 = vrot.lane.b32.xlu2 %v2162_v25, %s1982_s4  ;;  %v607_v25 = vsel %vm606_vm9, %v1851_v12, %v603_v19 }
 0x372   : > { %v612_v27 = vsel %vm609_vm10, %v611_v26, %v607_v25 }
 0x373   : > { %v613_v34 = vmul.f32 %v2172_v41, %v612_v27  ;;  %v885_v27 = vld [vmem:[%s2093_s15 + $0x98] sm:$0xff] }
 0x3c1   : > { %v755_v14 = vpop.xlane.xlu1 %754 }
 0x3c2   : > { %1852 = vrcp.f32 %v755_v14  ;;  %v767_v30 = vand.u32 2147483648, %v755_v14  ;;  %vm761_vm12 = vweird.f32 %v755_v14  ;;  %v765_v31 = vand.u32 2147483647, %v755_v14 }
 0x3c4   : > { %v768_v38 = vor.u32 1.1754944e-38, %v767_v30  ;;  %vm766_vm14 = vcmp.eq.f32.partialorder %v765_v31, 8.507059e+37  ;;  %v882_v30 = vld [vmem:[%s2093_s15 + $0x80] sm:$0xff]  ;;  %v1828_v31 = vld [vmem:[%s2122_s17 + $0x5] ss:$0 sm:$0xff] }
 0x3c8   : > { %v1853_v17 = vpop.eup %1852 }
 0x3c9   : > { %v757_v18 = vmul.f32 %v1853_v17, %v755_v14  ;;  %vm762_vm11 = vweird.f32 %v1853_v17 }
 0x3ca   : > { %vm763_vm13 = vmor %vm761_vm12, %vm762_vm11 }
 0x3cb   : > { %v758_v21 = vsub.f32 1.0, %v757_v18  ;;  %v881_v18 = vadd.f32 %v400_v16, %v2230_v15 }
 0x3cc   : > { %v677_v23 = vpop.xlane.xlu2 %676 }
 0x3cd   : > { %1854 = vrcp.f32 %v677_v23  ;;  %v759_v24 = vmul.f32 %v1853_v17, %v758_v21  ;;  %v689_v39 = vand.u32 2147483648, %v677_v23  ;;  %v687_v42 = vand.u32 2147483647, %v677_v23 }
 0x3ce   : > { %vm683_vm0 = vweird.f32 %v677_v23 }
 0x3cf   : > { %v760_v28 = vadd.f32 %v1853_v17, %v759_v24  ;;  %v690_v41 = vor.u32 1.1754944e-38, %v689_v39  ;;  %vm688_vm4 = vcmp.eq.f32.partialorder %v687_v42, 8.507059e+37 }
 0x3d1   : > { %v764_v36 = vsel %vm763_vm13, %v1853_v17, %v760_v28  ;;  %v884_v28 = vld [vmem:[%s2093_s15 + $0x90] sm:$0xff] }
 0x3d2   : > { %v769_v43 = vsel %vm766_vm14, %v768_v38, %v764_v36 }
 0x3d3   : > { %v1855_v29 = vpop.eup %1854  ;;  %v770_v47 = vmul.f32 %v2186_v2, %v769_v43 }
 0x3d4   : > { %v679_v32 = vmul.f32 %v1855_v29, %v677_v23  ;;  %v616_v33 = vpop.permute.xlu2 %615  ;;  %vm684_vm15 = vweird.f32 %v1855_v29 }
 0x3d5   : > { %636 = vmatpush.msrb.mxu1 %v616_v33  ;;  %vm685_vm3 = vmor %vm683_vm0, %vm684_vm15 }
 0x3d6   : > { %v680_v37 = vsub.f32 1.0, %v679_v32  ;;  %1687 = vmatmul.msk.f32.vlgmr.msrb.gmra.mxu1 %vm488_vm2, %v613_v34 }
 0x3d7   : > { %792 = vmatpush.msra.mxu1 %v772_v35 }
 0x3d8   : > { %v681_v40 = vmul.f32 %v1855_v29, %v680_v37 }
 0x3d9   : > { %v694_v44 = vpop.permute.xlu1 %693 }
 0x3da   : > { %v682_v45 = vadd.f32 %v1855_v29, %v681_v40  ;;  %714 = vmatpush.msrb.mxu3 %v694_v44 }
 0x3dc   : > { %v686_v46 = vsel %vm685_vm3, %v1855_v29, %v682_v45  ;;  %903 = vmatpush.msra.mxu3 %v885_v27  ;;  %v883_v29 = vld [vmem:[%s2093_s15 + $0x88] sm:$0xff] }
 0x3dd   : > { %v691_v48 = vsel %vm688_vm4, %v690_v41, %v686_v46  ;;  %v1826_v41 = vld [vmem:[%s2122_s17 + $0x8] ss:$0 sm:$0xff] }
 0x3de   : > { %1693 = vmatmul.msk.f32.vlgmr.msra.gmra.mxu1 %vm488_vm2, %v770_v47  ;;  %v692_v49 = vmul.f32 %v2190_v9, %v691_v48  ;;  %v2222_v9 = vld [vmem:[%s2112_s21] sm:$0xff]  ;;  %904 = vmatpush.msra.mxu3 %v884_v28  ;;  %v1827_v47 = vld [vmem:[%s2122_s17 + $0x9] ss:$0 sm:$0xff] }
 0x3df   : > { %v880_v14 = vadd.f32 %v399_v10, %v2222_v9 }
 0x3e0   : > { %1690 = vmatmul.msk.f32.vlgmr.msrb.gmra.mxu3 %vm488_vm2, %v692_v49 }
 0x3e1   : > { %1696 = vmatmul.msk.f32.vlgmr.msrb.gmra.mxu0 %vm408_vm1, %v880_v14  ;;  %905 = vmatpush.msra.mxu3 %v883_v29 }
 0x3e3   : > { %906 = vmatpush.msra.mxu3 %v882_v30 }
 0x3e9   : > { %1697 = vmatmul.msk.f32.gmra.mxu0 %vm408_vm1, %v881_v18 }
 0x453   : > { %v638_v50 = vpop.f32.mrf.mxu1 }
 0x454   : > { %798 = vrot.lane.b32.xlu2 %v638_v50, %s1985_s26 }
 0x45b   : > { %v794_v51 = vpop.f32.mrf.mxu1 }
 0x45c   : > { %806 = vrot.lane.b32.xlu1 %v794_v51, %s1986_s27 }
 0x45e   : > { %v941_v32 = vpop.f32.mrf.mxu0 }
 0x45f   : > { %v942_v35 = vadd.f32 %v1828_v31, %v941_v32 }
 0x463   : > { %v716_v52 = vpop.f32.mrf.mxu3 }
 0x464   : > { %802 = vrot.lane.b32.xlu0 %v716_v52, %s1987_s10  ;;  %v1829_v52 = vld [vmem:[%s2122_s17 + $0x4] ss:$0 sm:$0xff] }
 0x466   : > { %v944_v37 = vpop.f32.mrf.mxu0 }
 0x467   : > { %v945_v38 = vadd.f32 %v1828_v31, %v944_v37 }
 0x469   : > { %1062 = vrot.lane.b32.xlu1 %v945_v38, %s1982_s4  ;;  %1700 = vmatpush.xpose.msk.msra.mxu2 %vm488_vm2, %v945_v38 }
 0x46d   : > { %1701 = vmatpush.xpose.msk.msra.mxu2 %vm488_vm2, %v942_v35 }
 0x471   : > { %1060 = vrot.lane.b32.xlu1 %v942_v35, %s1982_s4 }
 0x479   : > { %1234 = vrot.lane.b32.xlu1 %v945_v38, %s1984_s25 }
 0x4ae   : > { %v799_v57 = vpop.permute.xlu2 %798 }
 0x4af   : > { %v809_v58 = vsel %vm488_vm2, %v2181_v60, %v799_v57  ;;  %v1988_v60 = vmov 32.0  }
 0x4b0   : > { %1856 = vrcp.f32 %v1988_v60  ;;  %v948_v60 = vld [vmem:[%s2093_s15 + $0xc8] sm:$0xff] }
 0x4b6   : > { %v1857_v12 = vpop.eup %1856 }
 0x4b7   : > { %vm854_vm7 = vweird.f32 %v1857_v12 }
 0x4ce   : > { %v807_v61 = vpop.permute.xlu1 %806 }
 0x4d6   : > { %v803_v59 = vpop.permute.xlu0 %802 }
 0x4d7   : > { %v811_v62 = vsel %vm810_vm5, %v809_v58, %v803_v59 }
 0x4d8   : > { %v813_v63 = vsel %vm812_vm6, %v811_v62, %v807_v61 }
 0x4d9   : > { %1694 = vmatmul.msk.f32.vlgmr.msrb.gmra.mxu2 %vm408_vm1, %v813_v63 }
 0x4db   : > { %v1063_v53 = vpop.permute.xlu1 %1062 }
 0x4dc   : > { %1704 = vmatpush.xpose.msk.msrb.mxu2 %vm488_vm2, %v1063_v53 }
 0x4e3   : > { %v1061_v57 = vpop.permute.xlu1 %1060 }
 0x4e4   : > { %1705 = vmatpush.xpose.msk.msrb.mxu2 %vm488_vm2, %v1061_v57 }
 0x55c   : > { %v840_v1 = vpop.f32.mrf.mxu2 }
 0x55d   : > { %v841_v2 = vadd.f32 %v1825_v0, %v840_v1 }
 0x55f   : > { %v843_v3 = vadd.f32 %v841_v2, %v2136_v7  ;;  %v850_v7 = vmul.f32 32.0, %v1857_v12 }
 0x561   : > { %v846_v4 = vsel %vm408_vm1, %v843_v3, 0.0  ;;  %v851_v17 = vsub.f32 1.0, %v850_v7 }
 0x562   : > { %847 = vadd.xlane.f32.xlu2 %v846_v4  ;;  %v949_v4 = vld [vmem:[%s2093_s15 + $0xd0] sm:$0xff] }
 0x563   : > { %v852_v19 = vmul.f32 %v1857_v12, %v851_v17 }
 0x565   : > { %v853_v20 = vadd.f32 %v1857_v12, %v852_v19  ;;  %v1830_v19 = vld [vmem:[%s2122_s17 + $0x6] ss:$0 sm:$0xff] }
 0x567   : > { %v2235_v21 = vsel %vm854_vm7, %v1857_v12, %v853_v20 }
 0x5d5   : > { %v848_v22 = vpop.xlane.xlu2 %847 }
 0x5d6   : > { %v856_v23 = vmul.f32 %v2235_v21, %v848_v22 }
 0x5d8   : > { %v857_v24 = vsub.f32 %v843_v3, %v856_v23  ;;  %v950_v3 = vld [vmem:[%s2093_s15 + $0xd8] sm:$0xff] }
 0x5d9   : > { %971 = vmatpush.msrb.mxu1 %v950_v3 }
 0x5da   : > { %v858_v25 = vmul.f32 %v857_v24, %v857_v24 }
 0x5db   : > { %972 = vmatpush.msrb.mxu1 %v949_v4 }
 0x5dc   : > { %v859_v26 = vsel %vm408_vm1, %v858_v25, 0.0 }
 0x5dd   : > { %860 = vadd.xlane.f32.xlu0 %v859_v26  ;;  %973 = vmatpush.msrb.mxu1 %v948_v60 }
 0x5df   : > { %974 = vmatpush.msrb.mxu1 %v947_v5 }
 0x5e0   : > { %1698 = vmatmul.msk.f32.vlgmr.msrb.gmra.mxu1 %vm408_vm1, %v2222_v9 }
 0x5e8   : > { %1699 = vmatmul.msk.f32.gmra.mxu1 %vm408_vm1, %v2230_v15 }
 0x5f1   : > { %1147 = vrot.lane.b32.xlu0 %v942_v35, %s1983_s24 }
 0x650   : > { %v861_v33 = vpop.xlane.xlu0 %860 }
 0x651   : > { %v862_v34 = vmul.f32 %v861_v33, %v2235_v21 }
 0x653   : > { %v863_v36 = vadd.f32 1e-05, %v862_v34 }
 0x655   : > { %1858 = vrsqrt.f32 %v863_v36  ;;  %vm870_vm9 = vweird.f32 %v863_v36 }
 0x65b   : > { %v1859_v39 = vpop.eup %1858 }
 0x65c   : > { %v865_v40 = vmul.f32 %v1859_v39, %v863_v36  ;;  %vm871_vm8 = vweird.f32 %v1859_v39 }
 0x65d   : > { %vm872_vm10 = vmor %vm870_vm9, %vm871_vm8  ;;  %v976_v18 = vpop.f32.mrf.mxu1 }
 0x65e   : > { %v866_v42 = vmul.f32 %v1859_v39, %v865_v40  ;;  %v977_v23 = vadd.f32 %v1830_v19, %v976_v18 }
 0x660   : > { %v867_v43 = vmul.f32 0.5, %v866_v42 }
 0x662   : > { %v868_v44 = vsub.f32 1.5, %v867_v43 }
 0x663   : > { %v1148_v1 = vpop.permute.xlu0 %1147 }
 0x664   : > { %v869_v45 = vmul.f32 %v1859_v39, %v868_v44 }
 0x665   : > { %v979_v20 = vpop.f32.mrf.mxu1 }
 0x666   : > { %v873_v46 = vsel %vm872_vm10, %v1859_v39, %v869_v45  ;;  %v980_v22 = vadd.f32 %v1830_v19, %v979_v20 }
 0x667   : > { %v874_v48 = vmul.f32 %v873_v46, %v857_v24 }
 0x668   : > { %1052 = vmatpush.msrb.mxu3 %v980_v22 }
 0x669   : > { %v876_v49 = vmul.f32 %v1826_v41, %v874_v48 }
 0x66a   : > { %1053 = vmatpush.msrb.mxu3 %v977_v23 }
 0x66b   : > { %v2253_v50 = vadd.f32 %v1827_v47, %v876_v49 }
 0x66d   : > { %v879_v51 = vadd.f32 %v2253_v50, %v2138_v8  ;;  %v1235_v8 = vpop.permute.xlu1 %1234 }
 0x66f   : > { %1695 = vmatmul.msk.f32.vlgmr.msra.gmra.mxu3 %vm408_vm1, %v879_v51 }
 0x6f2   : > { %v908_v54 = vpop.f32.mrf.mxu3 }
 0x6f3   : > { %v909_v55 = vadd.f32 %v1829_v52, %v908_v54  ;;  %v1807_v52 = vpack.i.bf16 %v977_v23, %v980_v22 }
 0x6f5   : > { %v911_v56 = vmul.f32 0.35355338, %v909_v55 }
 0x6f7   : > { %1230 = vrot.lane.b32.xlu2 %v911_v56, %s1984_s25  ;;  %1058 = vrot.lane.b32.xlu1 %v911_v56, %s1982_s4 }
 0x6f8   : > { %1702 = vmatmul.msk.f32.vlgmr.msra.gmra.mxu2 %vm488_vm2, %v911_v56 }
 0x6f9   : > { %1712 = vmatpush.xpose.msk.msra.mxu2 %vm488_vm2, %v1235_v8 }
 0x6ff   : > { %1232 = vrot.lane.b32.xlu1 %v942_v35, %s1984_s25 }
 0x707   : > { %1149 = vrot.lane.b32.xlu1 %v945_v38, %s1983_s24 }
 0x70f   : > { %1145 = vrot.lane.b32.xlu1 %v911_v56, %s1983_s24 }
 0x751   : > { %v1231_v61 = vpop.permute.xlu2 %1230 }
 0x769   : > { %v1059_v58 = vpop.permute.xlu1 %1058 }
 0x76a   : > { %1706 = vmatmul.msk.f32.vlgmr.msrb.gmra.mxu2 %vm488_vm2, %v1059_v58 }
 0x771   : > { %v1233_v59 = vpop.permute.xlu1 %1232 }
 0x772   : > { %1713 = vmatpush.xpose.msk.msra.mxu2 %vm488_vm2, %v1233_v59 }
 0x775   : > { %1714 = vmatmul.msk.f32.vlgmr.msra.gmra.mxu2 %vm488_vm2, %v1231_v61 }
 0x779   : > { %v1150_v62 = vpop.permute.xlu1 %1149 }
 0x77a   : > { %1708 = vmatpush.xpose.msk.msra.mxu0 %vm488_vm2, %v1150_v62 }
 0x77b   : > { %v1008_v63 = vpop.f32.mrf.mxu2 }
 0x77c   : > { %v1011_v0 = vsel %vm810_vm5, %v1008_v63, -inf }
 0x77d   : > { %1012 = vmax.xlane.f32.xlu1 %v1011_v0 }
 0x77e   : > { %1709 = vmatpush.xpose.msk.msra.mxu0 %vm488_vm2, %v1148_v1 }
 0x781   : > { %v1146_v2 = vpop.permute.xlu1 %1145 }
 0x782   : > { %1710 = vmatmul.msk.f32.vlgmr.msra.gmra.mxu0 %vm488_vm2, %v1146_v2 }
 0x7ed   : > { %v1087_v6 = vpop.f32.mrf.mxu2 }
 0x7ee   : > { %v1090_v10 = vsel %vm810_vm5, %v1087_v6, -inf }
 0x7ef   : > { %1091 = vmax.xlane.f32.xlu0 %v1090_v10 }
 0x7f0   : > { %v1013_v11 = vpop.xlane.xlu1 %1012 }
 0x7f1   : > { %v1014_v12 = vsub.f32 %v1008_v63, %v1013_v11 }
 0x7f3   : > { %v1015_v13 = vmul.f32 1.442695, %v1014_v12 }
 0x7f5   : > { %1860 = vpow2.f32 %v1015_v13 }
 0x7f8   : > { %v1259_v14 = vpop.f32.mrf.mxu2 }
 0x7f9   : > { %v1262_v7 = vsel %vm810_vm5, %v1259_v14, -inf }
 0x7fa   : > { %1263 = vmax.xlane.f32.xlu2 %v1262_v7 }
 0x7fb   : > { %v1861_v16 = vpop.eup %1860 }
 0x7fc   : > { %v1017_v17 = vsel %vm810_vm5, %v1861_v16, 0.0 }
 0x7fd   : > { %1018 = vadd.xlane.f32.xlu0 %v1017_v17 }
 0x7ff   : > { %v1174_v9 = vpop.f32.mrf.mxu0 }
 0x800   : > { %v1177_v15 = vsel %vm810_vm5, %v1174_v9, -inf }
 0x801   : > { %1178 = vmax.xlane.f32.xlu1 %v1177_v15 }
 0x862   : > { %v1092_v24 = vpop.xlane.xlu0 %1091 }
 0x863   : > { %v1093_v25 = vsub.f32 %v1087_v6, %v1092_v24 }
 0x865   : > { %v1094_v26 = vmul.f32 1.442695, %v1093_v25 }
 0x867   : > { %1862 = vpow2.f32 %v1094_v26 }
 0x86d   : > { %v2288_v27 = vpop.eup %1862  ;;  %v1264_v28 = vpop.xlane.xlu2 %1263 }
 0x86e   : > { %v1265_v29 = vsub.f32 %v1259_v14, %v1264_v28  ;;  %v1096_v30 = vsel %vm810_vm5, %v2288_v27, 0.0 }
 0x86f   : > { %1097 = vadd.xlane.f32.xlu2 %v1096_v30 }
 0x870   : > { %v1266_v31 = vmul.f32 1.442695, %v1265_v29  ;;  %v1019_v32 = vpop.xlane.xlu0 %1018 }
 0x871   : > { %1864 = vrcp.f32 %v1019_v32  ;;  %v1031_v42 = vand.u32 2147483648, %v1019_v32  ;;  %v1029_v44 = vand.u32 2147483647, %v1019_v32  ;;  %vm1025_vm12 = vweird.f32 %v1019_v32 }
 0x872   : > { %1866 = vpow2.f32 %v1266_v31 }
 0x873   : > { %v1032_v46 = vor.u32 1.1754944e-38, %v1031_v42  ;;  %vm1030_vm14 = vcmp.eq.f32.partialorder %v1029_v44, 8.507059e+37  ;;  %v1331_v42 = vld [vmem:[%s2093_s15 + $0xe8] sm:$0xff] }
 0x874   : > { %v1179_v33 = vpop.xlane.xlu1 %1178 }
 0x875   : > { %v1180_v34 = vsub.f32 %v1174_v9, %v1179_v33 }
 0x877   : > { %v1865_v35 = vpop.eup %1864  ;;  %v1181_v36 = vmul.f32 1.442695, %v1180_v34 }
 0x878   : > { %v2292_v37 = vpop.eup %1866  ;;  %v1021_v38 = vmul.f32 %v1865_v35, %v1019_v32  ;;  %vm1026_vm11 = vweird.f32 %v1865_v35 }
 0x879   : > { %1868 = vpow2.f32 %v1181_v36  ;;  %v1268_v39 = vsel %vm810_vm5, %v2292_v37, 0.0  ;;  %vm1027_vm13 = vmor %vm1025_vm12, %vm1026_vm11 }
 0x87a   : > { %v1022_v40 = vsub.f32 1.0, %v1021_v38  ;;  %1269 = vadd.xlane.f32.xlu1 %v1268_v39  ;;  %v1333_v39 = vld [vmem:[%s2093_s15 + $0xf8] sm:$0xff] }
 0x87b   : > { %1351 = vmatpush.msrb.mxu0 %v1333_v39 }
 0x87c   : > { %v1023_v43 = vmul.f32 %v1865_v35, %v1022_v40  ;;  %v1332_v40 = vld [vmem:[%s2093_s15 + $0xf0] sm:$0xff] }
 0x87d   : > { %1352 = vmatpush.msrb.mxu0 %v1332_v40 }
 0x87e   : > { %v1024_v45 = vadd.f32 %v1865_v35, %v1023_v43  ;;  %v1330_v43 = vld [vmem:[%s2093_s15 + $0xe0] sm:$0xff] }
 0x87f   : > { %v2296_v41 = vpop.eup %1868  ;;  %1353 = vmatpush.msrb.mxu0 %v1331_v42 }
 0x880   : > { %v1028_v47 = vsel %vm1027_vm13, %v1865_v35, %v1024_v45  ;;  %v1183_v48 = vsel %vm810_vm5, %v2296_v41, 0.0 }
 0x881   : > { %v1033_v49 = vsel %vm1030_vm14, %v1032_v46, %v1028_v47  ;;  %1184 = vadd.xlane.f32.xlu0 %v1183_v48  ;;  %1354 = vmatpush.msrb.mxu0 %v1330_v43 }
 0x882   : > { %v1034_v51 = vmul.f32 %v1861_v16, %v1033_v49  ;;  %v1831_v49 = vld [vmem:[%s2122_s17 + $0x7] ss:$0 sm:$0xff] }
 0x884   : > { %1703 = vmatmul.msk.f32.vlgmr.msrb.gmra.mxu3 %vm810_vm5, %v1034_v51 }
 0x887   : > { %1808 = vrot.lane.b32.xlu2 %v1807_v52, %s1982_s4 }
 0x893   : > { %1813 = vrot.lane.b32.xlu1 %v1807_v52, %s1984_s25 }
 0x895   : > { %1818 = vrot.lane.b32.xlu0 %v1807_v52, %s1983_s24 }
 0x8e2   : > { %v1098_v53 = vpop.xlane.xlu2 %1097 }
 0x8e3   : > { %1870 = vrcp.f32 %v1098_v53  ;;  %v1110_v58 = vand.u32 2147483648, %v1098_v53  ;;  %v1108_v63 = vand.u32 2147483647, %v1098_v53  ;;  %vm1104_vm0 = vweird.f32 %v1098_v53 }
 0x8e5   : > { %v1111_v1 = vor.u32 1.1754944e-38, %v1110_v58  ;;  %vm1109_vm4 = vcmp.eq.f32.partialorder %v1108_v63, 8.507059e+37  ;;  %v1425_v63 = vld [vmem:[%s2093_s15 + $0x158] sm:$0xff] }
 0x8e6   : > { %1440 = vmatpush.msrb.mxu2 %v1425_v63 }
 0x8e9   : > { %v1871_v54 = vpop.eup %1870 }
 0x8ea   : > { %v1100_v55 = vmul.f32 %v1871_v54, %v1098_v53  ;;  %v1809_v56 = vpop.permute.xlu2 %1808  ;;  %vm1105_vm15 = vweird.f32 %v1871_v54 }
 0x8eb   : > { %v1810_v57 = vunpack.i.l.bf16 %v1809_v56  ;;  %v1811_v59 = vunpack.i.h.bf16 %v1809_v56  ;;  %vm1106_vm3 = vmor %vm1104_vm0, %vm1105_vm15  ;;  %vm1428_vm15 = vcmask 523264  }
 0x8ec   : > { %v1101_v8 = vsub.f32 1.0, %v1100_v55 }
 0x8ed   : > { %v1270_v61 = vpop.xlane.xlu1 %1269  ;;  %1139 = vmatpush.msra.mxu3 %v1810_v57 }
 0x8ee   : > { %v1102_v62 = vmul.f32 %v1871_v54, %v1101_v8  ;;  %1872 = vrcp.f32 %v1270_v61  ;;  %v1282_v16 = vand.u32 2147483648, %v1270_v61  ;;  %vm1276_vm8 = vweird.f32 %v1270_v61 }
 0x8ef   : > { %1140 = vmatpush.msra.mxu3 %v1811_v59  ;;  %v1280_v9 = vand.u32 2147483647, %v1270_v61  ;;  %v1391_v59 = vld [vmem:[%s2093_s15 + $0x118] sm:$0xff] }
 0x8f0   : > { %v1103_v0 = vadd.f32 %v1871_v54, %v1102_v62  ;;  %v1283_v22 = vor.u32 1.1754944e-38, %v1282_v16  ;;  %v1388_v62 = vld [vmem:[%s2093_s15 + $0x100] sm:$0xff] }
 0x8f1   : > { %vm1281_vm13 = vcmp.eq.f32.partialorder %v1280_v9, 8.507059e+37  ;;  %v1833_v9 = vld [vmem:[%s2122_s17 + $0xb] ss:$0 sm:$0xff] }
 0x8f2   : > { %v1107_v2 = vsel %vm1106_vm3, %v1871_v54, %v1103_v0  ;;  %v1424_v0 = vld [vmem:[%s2093_s15 + $0x150] sm:$0xff] }
 0x8f3   : > { %v1112_v3 = vsel %vm1109_vm4, %v1111_v1, %v1107_v2  ;;  %v1423_v1 = vld [vmem:[%s2093_s15 + $0x148] sm:$0xff]  ;;  %1441 = vmatpush.msrb.mxu2 %v1424_v0 }
 0x8f4   : > { %v1873_v4 = vpop.eup %1872  ;;  %v1185_v60 = vpop.xlane.xlu0 %1184  ;;  %v1113_v5 = vmul.f32 %v2288_v27, %v1112_v3 }
 0x8f5   : > { %v1272_v6 = vmul.f32 %v1873_v4, %v1270_v61  ;;  %1874 = vrcp.f32 %v1185_v60  ;;  %vm1277_vm7 = vweird.f32 %v1873_v4  ;;  %v1197_v18 = vand.u32 2147483648, %v1185_v60  ;;  %v1390_v61 = vld [vmem:[%s2093_s15 + $0x110] sm:$0xff]  ;;  %1442 = vmatpush.msrb.mxu2 %v1423_v1 }
 0x8f6   : > { %1707 = vmatmul.msk.f32.vlgmr.msra.gmra.mxu3 %vm810_vm5, %v1113_v5  ;;  %vm1278_vm10 = vmor %vm1276_vm8, %vm1277_vm7  ;;  %vm1191_vm11 = vweird.f32 %v1185_v60  ;;  %v1195_v20 = vand.u32 2147483647, %v1185_v60  ;;  %v1421_v5 = vld [vmem:[%s2093_s15 + $0x138] sm:$0xff] }
 0x8f7   : > { %v1273_v10 = vsub.f32 1.0, %v1272_v6  ;;  %v1198_v26 = vor.u32 1.1754944e-38, %v1197_v18 }
 0x8f8   : > { %vm1196_vm14 = vcmp.eq.f32.partialorder %v1195_v20, 8.507059e+37  ;;  %v1419_v20 = vld [vmem:[%s2093_s15 + $0x128] sm:$0xff] }
 0x8f9   : > { %v1274_v12 = vmul.f32 %v1873_v4, %v1273_v10 }
 0x8fb   : > { %v1875_v11 = vpop.eup %1874  ;;  %v1275_v7 = vadd.f32 %v1873_v4, %v1274_v12 }
 0x8fc   : > { %v1187_v13 = vmul.f32 %v1875_v11, %v1185_v60  ;;  %vm1192_vm9 = vweird.f32 %v1875_v11 }
 0x8fd   : > { %v1279_v19 = vsel %vm1278_vm10, %v1873_v4, %v1275_v7  ;;  %vm1193_vm12 = vmor %vm1191_vm11, %vm1192_vm9  ;;  %v1422_v4 = vld [vmem:[%s2093_s15 + $0x140] sm:$0xff] }
 0x8fe   : > { %v1188_v14 = vsub.f32 1.0, %v1187_v13  ;;  %v1284_v25 = vsel %vm1281_vm13, %v1283_v22, %v1279_v19  ;;  %1443 = vmatpush.msrb.mxu2 %v1422_v4  ;;  %v1832_v7 = vld [vmem:[%s2122_s17 + $0xa] ss:$0 sm:$0xff]  ;;  %v1420_v19 = vld [vmem:[%s2093_s15 + $0x130] sm:$0xff] }
 0x8ff   : > { %v1285_v32 = vmul.f32 %v2292_v37, %v1284_v25  ;;  %v1418_v22 = vld [vmem:[%s2093_s15 + $0x120] sm:$0xff] }
 0x900   : > { %v1189_v17 = vmul.f32 %v1875_v11, %v1188_v14  ;;  %1444 = vmatpush.msrb.mxu2 %v1421_v5 }
 0x902   : > { %v1190_v15 = vadd.f32 %v1875_v11, %v1189_v17  ;;  %1445 = vmatpush.msrb.mxu2 %v1420_v19 }
 0x904   : > { %v1194_v23 = vsel %vm1193_vm12, %v1875_v11, %v1190_v15  ;;  %1446 = vmatpush.msrb.mxu2 %v1419_v20 }
 0x905   : > { %v1814_v24 = vpop.permute.xlu1 %1813  ;;  %v1199_v29 = vsel %vm1196_vm14, %v1198_v26, %v1194_v23  ;;  %v1834_v23 = vld [vmem:[%s2122_s17 + $0xe] ss:$0 sm:$0xff] }
 0x906   : > { %v1815_v27 = vunpack.i.l.bf16 %v1814_v24  ;;  %v1816_v30 = vunpack.i.h.bf16 %v1814_v24  ;;  %v1200_v34 = vmul.f32 %v2296_v41, %v1199_v29  ;;  %1447 = vmatpush.msrb.mxu2 %v1418_v22 }
 0x907   : > { %v1819_v28 = vpop.permute.xlu0 %1818  ;;  %v1055_v35 = vpop.f32.mrf.mxu3 }
 0x908   : > { %v1820_v31 = vunpack.i.l.bf16 %v1819_v28  ;;  %1309 = vmatpush.msrb.mxu3 %v1815_v27  ;;  %v1821_v33 = vunpack.i.h.bf16 %v1819_v28  ;;  %v1835_v27 = vld [vmem:[%s2122_s17 + $0xf] ss:$0 sm:$0xff] }
 0x90a   : > { %1224 = vmatpush.msra.mxu1 %v1820_v31  ;;  %1310 = vmatpush.msrb.mxu3 %v1816_v30 }
 0x90b   : > { %1715 = vmatmul.msk.f32.vlgmr.msrb.gmra.mxu3 %vm810_vm5, %v1285_v32 }
 0x90c   : > { %1225 = vmatpush.msra.mxu1 %v1821_v33 }
 0x90d   : > { %1711 = vmatmul.msk.f32.vlgmr.msra.gmra.mxu1 %vm810_vm5, %v1200_v34 }
 0x90e   : > { %1409 = vmatpush.msrb.mxu1 %v1391_v59 }
 0x910   : > { %1410 = vmatpush.msrb.mxu1 %v1390_v61 }
 0x979   : > { %v1142_v36 = vpop.f32.mrf.mxu3 }
 0x97a   : > { %1316 = vrot.lane.b32.xlu2 %v1142_v36, %s1985_s26 }
 0x98a   : > { %v1227_v38 = vpop.f32.mrf.mxu1 }
 0x98b   : > { %1320 = vrot.lane.b32.xlu0 %v1227_v38, %s1987_s10 }
 0x98e   : > { %v1312_v37 = vpop.f32.mrf.mxu3 }
 0x98f   : > { %1324 = vrot.lane.b32.xlu1 %v1312_v37, %s1986_s27 }
 0x9d4   : > { %v1317_v44 = vpop.permute.xlu2 %1316 }
 0x9d5   : > { %v1327_v41 = vsel %vm488_vm2, %v1055_v35, %v1317_v44 }
 0x9fd   : > { %v1321_v45 = vpop.permute.xlu0 %1320 }
 0x9fe   : > { %v1328_v46 = vsel %vm810_vm5, %v1327_v41, %v1321_v45 }
 0xa01   : > { %v1325_v47 = vpop.permute.xlu1 %1324 }
 0xa02   : > { %v1329_v48 = vsel %vm812_vm6, %v1328_v46, %v1325_v47  ;;  %v1836_v46 = vld [vmem:[%s2122_s17 + $0xc] ss:$0 sm:$0xff] }
 0xa03   : > { %1716 = vmatmul.msk.f32.vlgmr.msrb.gmra.mxu0 %vm408_vm1, %v1329_v48 }
 0xa80   : > { %v1356_v51 = vpop.f32.mrf.mxu0 }
 0xa81   : > { %v1357_v52 = vadd.f32 %v1831_v49, %v1356_v51  ;;  %v1837_v49 = vld [vmem:[%s2122_s17 + $0xd] ss:$0 sm:$0xff] }
 0xa83   : > { %v1359_v53 = vadd.f32 %v1357_v52, %v2253_v50  ;;  %v1389_v50 = vld [vmem:[%s2093_s15 + $0x108] sm:$0xff] }
 0xa84   : > { %1411 = vmatpush.msrb.mxu1 %v1389_v50 }
 0xa85   : > { %v1362_v54 = vsel %vm408_vm1, %v1359_v53, 0.0 }
 0xa86   : > { %1363 = vadd.xlane.f32.xlu2 %v1362_v54  ;;  %1412 = vmatpush.msrb.mxu1 %v1388_v62 }
 0xaf9   : > { %v1364_v55 = vpop.xlane.xlu2 %1363 }
 0xafa   : > { %v1365_v56 = vmul.f32 %v1364_v55, %v2235_v21 }
 0xafc   : > { %v1366_v57 = vsub.f32 %v1359_v53, %v1365_v56 }
 0xafe   : > { %v1367_v8 = vmul.f32 %v1366_v57, %v1366_v57 }
 0xb00   : > { %v1368_v58 = vsel %vm408_vm1, %v1367_v8, 0.0 }
 0xb01   : > { %1369 = vadd.xlane.f32.xlu0 %v1368_v58 }
 0xb74   : > { %v1370_v2 = vpop.xlane.xlu0 %1369 }
 0xb75   : > { %v1371_v3 = vmul.f32 %v1370_v2, %v2235_v21 }
 0xb77   : > { %v1372_v60 = vadd.f32 1e-05, %v1371_v3  ;;  %v1838_v3 = vld [vmem:[%s2122_s17 + $0x10] ss:$0 sm:$0xff] }
 0xb79   : > { %1876 = vrsqrt.f32 %v1372_v60  ;;  %vm1379_vm5 = vweird.f32 %v1372_v60 }
 0xb7f   : > { %v1877_v6 = vpop.eup %1876 }
 0xb80   : > { %v1374_v10 = vmul.f32 %v1877_v6, %v1372_v60  ;;  %vm1380_vm2 = vweird.f32 %v1877_v6  ;;  %v1839_v60 = vld [vmem:[%s2122_s17 + $0x11] ss:$0 sm:$0xff] }
 0xb81   : > { %vm1381_vm6 = vmor %vm1379_vm5, %vm1380_vm2 }
 0xb82   : > { %v1375_v11 = vmul.f32 %v1877_v6, %v1374_v10 }
 0xb84   : > { %v1376_v12 = vmul.f32 0.5, %v1375_v11 }
 0xb86   : > { %v1377_v13 = vsub.f32 1.5, %v1376_v12 }
 0xb88   : > { %v1378_v14 = vmul.f32 %v1877_v6, %v1377_v13 }
 0xb8a   : > { %v1382_v16 = vsel %vm1381_vm6, %v1877_v6, %v1378_v14 }
 0xb8b   : > { %v1383_v17 = vmul.f32 %v1382_v16, %v1366_v57 }
 0xb8d   : > { %v1385_v15 = vmul.f32 %v1832_v7, %v1383_v17 }
 0xb8f   : > { %v1387_v18 = vadd.f32 %v1833_v9, %v1385_v15 }
 0xb91   : > { %1717 = vmatmul.msk.f32.vlgmr.msrb.gmra.mxu1 %vm408_vm1, %v1387_v18 }
 0xc0e   : > { %v1414_v24 = vpop.f32.mrf.mxu1 }
 0xc0f   : > { %v1415_v25 = vadd.f32 %v1834_v23, %v1414_v24 }
 0xc11   : > { %v1417_v26 = vmax.f32 %v1415_v25, 0.0 }
 0xc13   : > { %1718 = vmatmul.msk.f32.vlgmr.msrb.gmra.mxu2 %vm1428_vm15, %v1417_v26 }
 0xc96   : > { %v1449_v28 = vpop.f32.mrf.mxu2 }
 0xc97   : > { %v1450_v29 = vadd.f32 %v1835_v27, %v1449_v28 }
 0xc99   : > { %v1452_v30 = vadd.f32 %v1450_v29, %v1387_v18 }
 0xc9b   : > { %v1455_v31 = vsel %vm408_vm1, %v1452_v30, 0.0 }
 0xc9c   : > { %1456 = vadd.xlane.f32.xlu1 %v1455_v31 }
 0xd0f   : > { %v1457_v32 = vpop.xlane.xlu1 %1456 }
 0xd10   : > { %v1458_v33 = vmul.f32 %v1457_v32, %v2235_v21 }
 0xd12   : > { %v1459_v34 = vsub.f32 %v1452_v30, %v1458_v33 }
 0xd14   : > { %v1460_v35 = vmul.f32 %v1459_v34, %v1459_v34 }
 0xd16   : > { %v1461_v36 = vsel %vm408_vm1, %v1460_v35, 0.0 }
 0xd17   : > { %1462 = vadd.xlane.f32.xlu2 %v1461_v36 }
 0xd8a   : > { %v1463_v38 = vpop.xlane.xlu2 %1462 }
 0xd8b   : > { %v1464_v37 = vmul.f32 %v1463_v38, %v2235_v21 }
 0xd8d   : > { %v1465_v39 = vadd.f32 1e-05, %v1464_v37 }
 0xd8f   : > { %1878 = vrsqrt.f32 %v1465_v39  ;;  %vm1472_vm3 = vweird.f32 %v1465_v39 }
 0xd95   : > { %v1879_v40 = vpop.eup %1878 }
 0xd96   : > { %v1467_v42 = vmul.f32 %v1879_v40, %v1465_v39  ;;  %vm1473_vm0 = vweird.f32 %v1879_v40 }
 0xd97   : > { %vm1474_vm4 = vmor %vm1472_vm3, %vm1473_vm0 }
 0xd98   : > { %v1468_v43 = vmul.f32 %v1879_v40, %v1467_v42 }
 0xd9a   : > { %v1469_v44 = vmul.f32 0.5, %v1468_v43 }
 0xd9c   : > { %v1470_v45 = vsub.f32 1.5, %v1469_v44 }
 0xd9e   : > { %v1471_v41 = vmul.f32 %v1879_v40, %v1470_v45 }
 0xda0   : > { %v1475_v47 = vsel %vm1474_vm4, %v1879_v40, %v1471_v41 }
 0xda1   : > { %v1476_v48 = vmul.f32 %v1475_v47, %v1459_v34 }
 0xda3   : > { %v1478_v51 = vmul.f32 %v1836_v46, %v1476_v48 }
 0xda5   : > { %v1480_v52 = vadd.f32 %v1837_v49, %v1478_v51 }
 0xda7   : > { %v1484_v53 = vsel %vm408_vm1, %v1480_v52, 0.0  ;;  %1481 = vst.msk [vmem:[#allocation2] sm:$0xff] %vm408_vm1, %v1480_v52 }
 0xda8   : > { %1485 = vadd.xlane.f32.xlu0 %v1484_v53 }
 0xe1b   : > { %v1486_v54 = vpop.xlane.xlu0 %1485 }
 0xe1c   : > { %v1487_v55 = vmul.f32 %v1486_v54, %v2235_v21 }
 0xe1e   : > { %v1488_v56 = vsub.f32 %v1480_v52, %v1487_v55 }
 0xe20   : > { %v1489_v57 = vmul.f32 %v1488_v56, %v1488_v56 }
 0xe22   : > { %v1490_v8 = vsel %vm408_vm1, %v1489_v57, 0.0 }
 0xe23   : > { %1491 = vadd.xlane.f32.xlu1 %v1490_v8 }
 0xe96   : > { %v1492_v58 = vpop.xlane.xlu1 %1491 }
 0xe97   : > { %v1493_v59 = vmul.f32 %v1492_v58, %v2235_v21 }
 0xe99   : > { %v1494_v61 = vadd.f32 1e-05, %v1493_v59 }
 0xe9b   : > { %1880 = vrsqrt.f32 %v1494_v61  ;;  %vm1501_vm8 = vweird.f32 %v1494_v61 }
 0xea1   : > { %v1881_v50 = vpop.eup %1880 }
 0xea2   : > { %v1496_v62 = vmul.f32 %v1881_v50, %v1494_v61  ;;  %vm1502_vm7 = vweird.f32 %v1881_v50 }
 0xea3   : > { %vm1503_vm9 = vmor %vm1501_vm8, %vm1502_vm7 }
 0xea4   : > { %v1497_v63 = vmul.f32 %v1881_v50, %v1496_v62 }
 0xea6   : > { %v1498_v0 = vmul.f32 0.5, %v1497_v63 }
 0xea8   : > { %v1499_v1 = vsub.f32 1.5, %v1498_v0 }
 0xeaa   : > { %v1500_v2 = vmul.f32 %v1881_v50, %v1499_v1 }
 0xeac   : > { %v1504_v4 = vsel %vm1503_vm9, %v1881_v50, %v1500_v2 }
 0xead   : > { %v1505_v5 = vmul.f32 %v1504_v4, %v1488_v56 }
 0xeaf   : > { %v1507_v6 = vmul.f32 %v1838_v3, %v1505_v5 }
 0xeb1   : > { %v1509_v10 = vadd.f32 %v1839_v60, %v1507_v6 }
 0xeb3   : > { %1510 = vst.msk [vmem:[%s2127_s12] sm:$0xff] %vm408_vm1, %v1509_v10 }
 0xeb4 PF: > { %s19_s28 = sadd.s32 1, %s1978_s28   ;;  %s2401_s15 = sld [smem:[#allocation10_spill]] }
 0xeb5   : > { %p16_p3 = scmp.ge.s32.totalorder %s19_s28, 8   ;;  %s2402_s24 = sld [smem:[#allocation6_spill]] }
 0xeb6   : > { %s2403_s25 = sld [smem:[#allocation7_spill]]  ;;  %s2406_s21 = smov %s1954_s22 }
 0xeb7   : > { %s2404_s26 = sld [smem:[#allocation8_spill]]  ;;  %s2407_s22 = smov %s1958_s23 }
 0xeb8   : > { %s2405_s27 = sld [smem:[#allocation9_spill]]  ;;  %18 = sbr.rel (!%p16_p3) target bundleno = 7 (0x7), region = 103 }
 0xeba   : > { %s2408_s23 = smov %s2401_s15 }
 0xebd   :  { %1538 = vsyncpa [#allocation4], 1 }
 0xebe   :  { %1540 = vsyncpa [#allocation4 + $0x1], 1 }

</bundles_post_ra>
